<compile_context>
chip_gen: v7x
topology: tpu7x:2x2x1
jax: 0.10.0
libtpu: 0.0.40
codegen_flags: <defaults>
</compile_context>

<pallas_src>
import functools

import jax
import jax.numpy as jnp
from jax import lax
from jax.experimental import pallas as pl
from jax.experimental.pallas import tpu as pltpu


def _round_up(x, m):
    return (x + m - 1) // m * m


def _cdiv(a, b):
    return -(-a // b)


def _make_kernel(dout, n_pad, te):
    """Edge-tile kernel: fused gather+Ce matmul, sigma^p, one-hot MXU scatter."""

    def kernel(idx_ref, dstrow_ref, e_ref, rhs_ref, bc_ref, p_ref,
               bne_scale_ref, bne_shift_ref,
               hsum_ref, e_out_ref):
        f32 = jnp.float32
        t = pl.program_id(1)

        # Zero the per-core partial-sum accumulator on this core's first tile.
        @pl.when(t == 0)
        def _():
            hsum_ref[...] = jnp.zeros_like(hsum_ref)

        p = p_ref[...]                                   # [1, Dout] = |P|+1e-6

        idx = idx_ref[...]                               # [TE, 2] int32 (src,dst)
        src = idx[:, 0:1]                                # [TE, 1]
        dst = idx[:, 1:2]                                # [TE, 1]
        dst_row = dstrow_ref[...]                        # [1, TE]

        # Combined one-hot [TE, 2*Npad]: column src selects the [Dh|Bh^p] rows,
        # column Npad+dst selects the Eh rows.  Built in-register (VPU iota).
        lane = lax.broadcasted_iota(jnp.int32, (te, 2 * n_pad), 1)
        onehot = jnp.logical_or(lane == src, lane == dst + n_pad).astype(f32)

        # One MXU pass: [onehot | e_tile] @ [[Dh|Bh^p],[Eh|0],[Wc|0]]
        lhs = jnp.concatenate([onehot, e_ref[...]], axis=1)        # [TE, 2*Npad+Din]
        g = jnp.dot(lhs, rhs_ref[...], preferred_element_type=f32)  # [TE, 2*Dout]
        e_new = g[:, :dout] + bc_ref[...]                # Dh[src] + Eh[dst] + Ce
        bhp_src = g[:, dout:]                            # |Bh|^p [src]  (exact)

        # sigma^p = exp(p * log_sigmoid(e_new)); sigma > 0 so no abs needed.
        # (stable formulation; residual log(1+eps) error <= ~2^-23 in the
        #  exponent, i.e. <= ~1.3e-6 relative after exp even for p ~ 11)
        log_sig = jnp.minimum(e_new, 0.0) - jnp.log(1.0 + jnp.exp(-jnp.abs(e_new)))
        sig_pow = jnp.exp(p * log_sig)                   # [TE, Dout]
        msg = bhp_src * sig_pow                          # [TE, Dout]

        # Edge output: BatchNorm (eval, folded into scale/shift) + ReLU.
        e_out_ref[...] = jnp.maximum(
            e_new * bne_scale_ref[...] + bne_shift_ref[...], 0.0)

        # Fused scatter-add into [sum_sigma_h | sum_sigma]; one-hot built
        # pre-transposed ([Npad, TE]) so no XLU transpose of the big tile.
        sub = lax.broadcasted_iota(jnp.int32, (n_pad, te), 0)
        scatter = (sub == dst_row).astype(f32)           # [Npad, TE]
        rhs_sc = jnp.concatenate([msg, sig_pow], axis=1)  # [TE, 2*Dout]
        hsum_ref[...] += jnp.dot(scatter, rhs_sc, preferred_element_type=f32)
        # TODO(synk): dropout is identity in eval mode; residual=False (default).

    return kernel


def prepare_layer(params):
    """One-time, per-layer precomputation (hoisted out of the per-call path):
    fused node weight/bias and the effective exponent p.  BatchNorm running
    stats are assumed already folded into {bnh,bne}_{scale,shift} (eval)."""
    w_node = jnp.concatenate(
        [params["wd"], params["wb"], params["we"], params["wa"]], axis=1)
    b_node = jnp.concatenate(
        [params["bd"], params["bb"], params["be"], params["ba"]], axis=1)
    return dict(
        w_node=w_node, b_node=b_node,
        p=jnp.abs(params["P"]) + 1e-6,
        wc=params["wc"], bc=params["bc"],
        bnh_scale=params["bnh_scale"], bnh_shift=params["bnh_shift"],
        bne_scale=params["bne_scale"], bne_shift=params["bne_shift"])


def prepare_graph(src, dst, n_nodes, *, edge_tile=256, n_core_split=2):
    """One-time, per-graph precomputation (cache when the graph is static):
    padded & packed index buffers.  Padded edges point at a dummy node row
    (index n_nodes) so no in-kernel masking is needed."""
    edge_tile = max(128, _round_up(edge_tile, 128))
    e_cnt = int(src.shape[0])
    te = max(128, min(edge_tile,
                      _round_up(_cdiv(max(e_cnt, 1), n_core_split), 128)))
    ntpc = _cdiv(max(e_cnt, 1), te * n_core_split)       # edge tiles per core
    e_pad = n_core_split * ntpc * te
    dummy = jnp.int32(n_nodes)
    src_p = jnp.full((e_pad,), dummy, jnp.int32).at[:e_cnt].set(src.astype(jnp.int32))
    dst_p = jnp.full((e_pad,), dummy, jnp.int32).at[:e_cnt].set(dst.astype(jnp.int32))
    return dict(
        idx_cols=jnp.stack([src_p, dst_p], axis=1),      # [E_pad, 2]
        dst_row=dst_p.reshape(1, e_pad),                 # [1, E_pad]
        te=te, ntpc=ntpc, n_core_split=n_core_split)


def _vmem_limit_bytes(n_pad, din, dout, te):
    """Shape-derived VMEM budget (instead of a hard-coded 32 MiB); capped so it
    stays comfortably inside v7x's 64 MiB per-TC physical VMEM."""
    f = 4  # f32 bytes
    resident = 2 * (2 * n_pad + din) * 2 * dout * f                 # block RHS
    tiles = 2 * f * (te * 3 + te * din + te * dout + n_pad * 2 * dout)
    temps = f * (te * 2 * n_pad + te * (2 * n_pad + din)
                 + n_pad * te + 6 * te * dout)
    est = resident + tiles + temps + (1 << 20)
    return int(min(max(2 * est, 8 << 20), 48 << 20))


@functools.partial(jax.jit, static_argnames=("te", "ntpc", "n_core_split"))
def _forward(h, e, idx_cols, dst_row, fused, *, te, ntpc, n_core_split):
    n, din = h.shape
    e_cnt = e.shape[0]
    dout = fused["wc"].shape[1]
    n_pad = _round_up(n + 1, 128)          # +1 dummy node absorbs padded edges
    e_pad = n_core_split * ntpc * te
    p = fused["p"]

    # ---- node-side projection in plain XLA (off the kernel's critical path;
    # only an [Npad, 4*Dout] HBM round trip, XLA runs this matmul at peak) ----
    h_pad = jnp.zeros((n_pad, din), jnp.float32).at[:n].set(h.astype(jnp.float32))
    proj = h_pad @ fused["w_node"] + fused["b_node"]     # [Npad, 4*Dout]
    dh = proj[:, 0 * dout:1 * dout]
    bh = proj[:, 1 * dout:2 * dout]
    eh = proj[:, 2 * dout:3 * dout]
    ah = proj[:, 3 * dout:4 * dout]
    bh_pow = jnp.abs(bh) ** p

    # Block RHS for the fused edge matmul: rows = [[Dh|Bh^p], [Eh|0], [Wc|0]].
    zer_n = jnp.zeros((n_pad, dout), jnp.float32)
    zer_k = jnp.zeros((din, dout), jnp.float32)
    rhs_edge = jnp.concatenate([
        jnp.concatenate([dh, bh_pow], axis=1),
        jnp.concatenate([eh, zer_n], axis=1),
        jnp.concatenate([fused["wc"].astype(jnp.float32), zer_k], axis=1)],
        axis=0)                                          # [2*Npad+Din, 2*Dout]

    e_p = jnp.zeros((e_pad, din), jnp.float32).at[:e_cnt].set(e.astype(jnp.float32))

    edge_blk = lambda c, t: (c * ntpc + t, 0)
    edge_row = lambda c, t: (0, c * ntpc + t)
    const = lambda c, t: (0, 0)

    grid_spec = pltpu.PrefetchScalarGridSpec(
        num_scalar_prefetch=0,
        grid=(n_core_split, ntpc),
        in_specs=[
            pl.BlockSpec((te, 2), edge_blk),                      # packed src/dst
            pl.BlockSpec((1, te), edge_row),                      # dst (row form)
            pl.BlockSpec((te, din), edge_blk),                    # e tile
            pl.BlockSpec((2 * n_pad + din, 2 * dout), const),     # block RHS
            pl.BlockSpec((1, dout), const),                       # bc
            pl.BlockSpec((1, dout), const),                       # p
            pl.BlockSpec((1, dout), const),                       # bn_e scale
            pl.BlockSpec((1, dout), const),                       # bn_e shift
        ],
        out_specs=(
            pl.BlockSpec((n_pad, 2 * dout), lambda c, t: (c, 0)),  # per-core partials
            pl.BlockSpec((te, dout), edge_blk),                    # e_out tile
        ),
        scratch_shapes=[],
    )

    flops = (2 * e_pad * (2 * n_pad + din) * 2 * dout     # fused gather + Ce
             + 2 * e_pad * n_pad * 2 * dout)              # one-hot scatter-add
    transcendentals = 3 * e_pad * dout
    bytes_accessed = 4 * (e_pad * (din + dout + 3)
                          + (2 * n_pad + din) * 2 * dout
                          + n_core_split * n_pad * 2 * dout + 6 * dout)

    h_part, e_out_p = pl.pallas_call(
        _make_kernel(dout, n_pad, te),
        out_shape=(
            jax.ShapeDtypeStruct((n_core_split * n_pad, 2 * dout), jnp.float32),
            jax.ShapeDtypeStruct((e_pad, dout), jnp.float32),
        ),
        grid_spec=grid_spec,
        compiler_params=pltpu.CompilerParams(
            dimension_semantics=("parallel", "arbitrary"),
            vmem_limit_bytes=_vmem_limit_bytes(n_pad, din, dout, te),
        ),
        cost_estimate=pl.CostEstimate(
            flops=flops, transcendentals=transcendentals,
            bytes_accessed=bytes_accessed),
    )(idx_cols, dst_row, e_p, rhs_edge, fused["bc"], p,
      fused["bne_scale"], fused["bne_shift"])

    # ---- tiny XLA epilogue: combine per-core partials, finalize node output ----
    sums = h_part.reshape(n_core_split, n_pad, 2 * dout).sum(axis=0)
    sum_sigma_h = sums[:n, :dout]
    sum_sigma = sums[:n, dout:]
    h_new = ah[:n] + (sum_sigma_h / (sum_sigma + 1e-6)) ** (1.0 / p)
    h_out = jnp.maximum(h_new * fused["bnh_scale"] + fused["bnh_shift"], 0.0)
    return h_out, e_out_p[:e_cnt]


def my_graph_layer(h, e, src, dst, params, *, edge_tile=256, n_core_split=2):
    # In real use, cache the results of prepare_layer / prepare_graph.
    fused = prepare_layer(params)
    g = prepare_graph(src, dst, h.shape[0],
                      edge_tile=edge_tile, n_core_split=n_core_split)
    return _forward(h, e, g["idx_cols"], g["dst_row"], fused,
                    te=g["te"], ntpc=g["ntpc"], n_core_split=g["n_core_split"])


def reference(h, e, src, dst, params):
    """Pure-JAX reference of the PyTorch forward (eval mode)."""
    def lin(x, w, b):
        return x @ w + b
    Ah = lin(h, params["wa"], params["ba"])
    Bh = lin(h, params["wb"], params["bb"])
    Ce = lin(e, params["wc"], params["bc"])
    Dh = lin(h, params["wd"], params["bd"])
    Eh = lin(h, params["we"], params["be"])
    p = jnp.abs(params["P"]) + 1e-6
    e_new = Dh[src] + Eh[dst] + Ce
    sigma = jax.nn.sigmoid(e_new)
    Bh_pow = jnp.abs(Bh) ** p
    sig_pow = jnp.abs(sigma) ** p
    msg = Bh_pow[src] * sig_pow
    N = h.shape[0]
    sum_sigma_h = jax.ops.segment_sum(msg, dst, num_segments=N)
    sum_sigma = jax.ops.segment_sum(sig_pow, dst, num_segments=N)
    h_new = Ah + (sum_sigma_h / (sum_sigma + 1e-6)) ** (1.0 / p)
    h_out = jax.nn.relu(h_new * params["bnh_scale"] + params["bnh_shift"])
    e_out = jax.nn.relu(e_new * params["bne_scale"] + params["bne_shift"])
    return h_out, e_out


def init_params(key, din, dout):
    ks = jax.random.split(key, 11)
    lim = 1.0 / jnp.sqrt(din)

    def linear(kw, kb):
        w = jax.random.uniform(kw, (din, dout), jnp.float32, -lim, lim)
        b = jax.random.uniform(kb, (1, dout), jnp.float32, -lim, lim)
        return w, b

    wa, ba = linear(ks[0], ks[1])
    wb, bb = linear(ks[2], ks[3])
    wc, bc = linear(ks[4], ks[5])
    wd, bd = linear(ks[6], ks[7])
    we, be = linear(ks[8], ks[9])
    P = jax.random.uniform(ks[10], (1, dout), jnp.float32) * 10.0 + 1.0

    # BatchNorm1d eval mode with default stats: mean=0, var=1, gamma=1, beta=0.
    # A general caller must fold running mean/var into these scale/shift terms.
    eps = 1e-5
    bn_scale = jnp.full((1, dout), 1.0 / jnp.sqrt(1.0 + eps), jnp.float32)
    bn_shift = jnp.zeros((1, dout), jnp.float32)
    return dict(
        wa=wa, ba=ba, wb=wb, bb=bb, wc=wc, bc=bc, wd=wd, bd=bd, we=we, be=be,
        P=P, bnh_scale=bn_scale, bnh_shift=bn_shift,
        bne_scale=bn_scale, bne_shift=bn_shift,
    )


if __name__ == "__main__":
    key = jax.random.PRNGKey(0)
    k_h, k_e, k_src, k_dst, k_params = jax.random.split(key, 5)

    # nodes, edges, feature dim (input_dim == output_dim)
    N, E, D = 64, 256, 32
    h = jax.random.normal(k_h, (N, D), jnp.float32)
    e = jax.random.normal(k_e, (E, D), jnp.float32)
    src = jax.random.randint(k_src, (E,), 0, N, jnp.int32)
    dst = jax.random.randint(k_dst, (E,), 0, N, jnp.int32)

    params = init_params(k_params, D, D)

    h_out, e_out = my_graph_layer(h, e, src, dst, params)
    jax.block_until_ready((h_out, e_out))

    h_ref, e_ref = reference(h, e, src, dst, params)
    assert jnp.allclose(h_out, h_ref, atol=2e-3, rtol=2e-3), "h mismatch"
    assert jnp.allclose(e_out, e_ref, atol=2e-3, rtol=2e-3), "e mismatch"

    print("KERNEL_OK")
</pallas_src>

<mosaic_0001>
module attributes {stable_mosaic.version = 11 : i64} {
  func.func @kernel(%arg0: i32, %arg1: i32, %arg2: memref<128x2xi32, #tpu.memory_space<vmem>>, %arg3: memref<1x128xi32, #tpu.memory_space<vmem>>, %arg4: memref<128x32xf32, #tpu.memory_space<vmem>>, %arg5: memref<288x64xf32, #tpu.memory_space<vmem>>, %arg6: memref<1x32xf32, #tpu.memory_space<vmem>>, %arg7: memref<1x32xf32, #tpu.memory_space<vmem>>, %arg8: memref<1x32xf32, #tpu.memory_space<vmem>>, %arg9: memref<1x32xf32, #tpu.memory_space<vmem>>, %arg10: memref<128x64xf32, #tpu.memory_space<vmem>>, %arg11: memref<128x32xf32, #tpu.memory_space<vmem>>) attributes {dimension_semantics = [#tpu.dimension_semantics<parallel>, #tpu.dimension_semantics<arbitrary>], iteration_bounds = array<i64: 2, 1>, scalar_prefetch = 0 : i64, scratch_operands = 0 : i64, tpu.core_type = #tpu.core_type<tc>, window_params = [{transform_indices = @transform_0, window_bounds = array<i64: 128, 2>}, {transform_indices = @transform_1, window_bounds = array<i64: 1, 128>}, {transform_indices = @transform_2, window_bounds = array<i64: 128, 32>}, {pipeline_mode = #tpu.pipeline_mode<synchronous>, transform_indices = @transform_3, window_bounds = array<i64: 288, 64>}, {pipeline_mode = #tpu.pipeline_mode<synchronous>, transform_indices = @transform_4, window_bounds = array<i64: 1, 32>}, {pipeline_mode = #tpu.pipeline_mode<synchronous>, transform_indices = @transform_5, window_bounds = array<i64: 1, 32>}, {pipeline_mode = #tpu.pipeline_mode<synchronous>, transform_indices = @transform_6, window_bounds = array<i64: 1, 32>}, {pipeline_mode = #tpu.pipeline_mode<synchronous>, transform_indices = @transform_7, window_bounds = array<i64: 1, 32>}, {transform_indices = @transform_8, window_bounds = array<i64: 128, 64>}, {transform_indices = @transform_9, window_bounds = array<i64: 128, 32>}]} {
    %c0_i32 = arith.constant 0 : i32
    %0 = arith.cmpi eq, %arg1, %c0_i32 : i32
    %1 = arith.extui %0 : i1 to i32
    %c0_i32_0 = arith.constant 0 : i32
    %2 = arith.cmpi ne, %1, %c0_i32_0 : i32
    scf.if %2 {
      %cst_27 = arith.constant 0.000000e+00 : f32
      %60 = vector.broadcast %cst_27 : f32 to vector<128x64xf32>
      %c0_28 = arith.constant 0 : index
      %c0_29 = arith.constant 0 : index
      %61 = vector.load %arg10[%c0_28, %c0_29] : memref<128x64xf32, #tpu.memory_space<vmem>>, vector<128x64xf32>
      tpu.vector_store %arg10[%c0_28, %c0_29], %60 {strides = array<i32>} : memref<128x64xf32, #tpu.memory_space<vmem>>, vector<128x64xf32>,
    } else {
    }
    %c0 = arith.constant 0 : index
    %c0_1 = arith.constant 0 : index
    %3 = vector.load %arg7[%c0, %c0_1] : memref<1x32xf32, #tpu.memory_space<vmem>>, vector<1x32xf32>
    %c0_2 = arith.constant 0 : index
    %c0_3 = arith.constant 0 : index
    %4 = vector.load %arg2[%c0_2, %c0_3] : memref<128x2xi32, #tpu.memory_space<vmem>>, vector<128x2xi32>
    %5 = vector.extract_strided_slice %4 {offsets = [0, 0], sizes = [128, 1], strides = [1, 1]} : vector<128x2xi32> to vector<128x1xi32>
    %6 = vector.extract_strided_slice %4 {offsets = [0, 1], sizes = [128, 1], strides = [1, 1]} : vector<128x2xi32> to vector<128x1xi32>
    %c0_4 = arith.constant 0 : index
    %c0_5 = arith.constant 0 : index
    %7 = vector.load %arg3[%c0_4, %c0_5] : memref<1x128xi32, #tpu.memory_space<vmem>>, vector<1x128xi32>
    %8 = tpu.iota {dimensions = array<i32: 1>} : vector<128x256xi32>
    %9 = vector.broadcast %5 : vector<128x1xi32> to vector<128x256xi32>
    %10 = arith.cmpi eq, %8, %9 : vector<128x256xi32>
    %c128_i32 = arith.constant 128 : i32
    %11 = vector.broadcast %c128_i32 : i32 to vector<128x1xi32>
    %12 = arith.addi %6, %11 : vector<128x1xi32>
    %13 = vector.broadcast %12 : vector<128x1xi32> to vector<128x256xi32>
    %14 = arith.cmpi eq, %8, %13 : vector<128x256xi32>
    %15 = arith.ori %10, %14 : vector<128x256xi1>
    %16 = arith.extui %15 : vector<128x256xi1> to vector<128x256xi32>
    %17 = arith.sitofp %16 : vector<128x256xi32> to vector<128x256xf32>
    %c0_6 = arith.constant 0 : index
    %c0_7 = arith.constant 0 : index
    %18 = vector.load %arg4[%c0_6, %c0_7] : memref<128x32xf32, #tpu.memory_space<vmem>>, vector<128x32xf32>
    %19 = tpu.concatenate %17, %18 in 1 : vector<128x256xf32>, vector<128x32xf32> -> vector<128x288xf32>
    %c0_8 = arith.constant 0 : index
    %c0_9 = arith.constant 0 : index
    %20 = vector.load %arg5[%c0_8, %c0_9] : memref<288x64xf32, #tpu.memory_space<vmem>>, vector<288x64xf32>
    %cst = arith.constant dense<0.000000e+00> : vector<128x64xf32>
    %21 = tpu.matmul %19, %20, %cst {dimension_numbers = #tpu.dot_dimension_numbers<[1], [0], [0], [1], [0, 0, 1, 1], [], []>} : vector<128x288xf32>, vector<288x64xf32>, vector<128x64xf32> -> vector<128x64xf32>
    %22 = vector.extract_strided_slice %21 {offsets = [0, 0], sizes = [128, 32], strides = [1, 1]} : vector<128x64xf32> to vector<128x32xf32>
    %c0_10 = arith.constant 0 : index
    %c0_11 = arith.constant 0 : index
    %23 = vector.load %arg6[%c0_10, %c0_11] : memref<1x32xf32, #tpu.memory_space<vmem>>, vector<1x32xf32>
    %24 = vector.broadcast %23 : vector<1x32xf32> to vector<128x32xf32>
    %25 = arith.addf %22, %24 : vector<128x32xf32>
    %26 = vector.extract_strided_slice %21 {offsets = [0, 32], sizes = [128, 32], strides = [1, 1]} : vector<128x64xf32> to vector<128x32xf32>
    %cst_12 = arith.constant 0.000000e+00 : f32
    %27 = vector.broadcast %cst_12 : f32 to vector<128x32xf32>
    %28 = arith.minimumf %25, %27 : vector<128x32xf32>
    %29 = math.absf %25 : vector<128x32xf32>
    %cst_13 = arith.constant 0.000000e+00 : f32
    %30 = vector.broadcast %cst_13 : f32 to vector<128x32xf32>
    %31 = arith.subf %30, %29 : vector<128x32xf32>
    %32 = math.exp %31 : vector<128x32xf32>
    %cst_14 = arith.constant 1.000000e+00 : f32
    %33 = vector.broadcast %cst_14 : f32 to vector<128x32xf32>
    %34 = arith.addf %33, %32 : vector<128x32xf32>
    %35 = math.log %34 : vector<128x32xf32>
    %36 = arith.subf %28, %35 : vector<128x32xf32>
    %37 = vector.broadcast %3 : vector<1x32xf32> to vector<128x32xf32>
    %38 = arith.mulf %37, %36 : vector<128x32xf32>
    %39 = math.exp %38 : vector<128x32xf32>
    %40 = arith.mulf %26, %39 : vector<128x32xf32>
    %c0_15 = arith.constant 0 : index
    %c0_16 = arith.constant 0 : index
    %41 = vector.load %arg8[%c0_15, %c0_16] : memref<1x32xf32, #tpu.memory_space<vmem>>, vector<1x32xf32>
    %42 = vector.broadcast %41 : vector<1x32xf32> to vector<128x32xf32>
    %43 = arith.mulf %25, %42 : vector<128x32xf32>
    %c0_17 = arith.constant 0 : index
    %c0_18 = arith.constant 0 : index
    %44 = vector.load %arg9[%c0_17, %c0_18] : memref<1x32xf32, #tpu.memory_space<vmem>>, vector<1x32xf32>
    %45 = vector.broadcast %44 : vector<1x32xf32> to vector<128x32xf32>
    %46 = arith.addf %43, %45 : vector<128x32xf32>
    %cst_19 = arith.constant 0.000000e+00 : f32
    %47 = vector.broadcast %cst_19 : f32 to vector<128x32xf32>
    %48 = arith.maximumf %46, %47 : vector<128x32xf32>
    %c0_20 = arith.constant 0 : index
    %c0_21 = arith.constant 0 : index
    %49 = vector.load %arg11[%c0_20, %c0_21] : memref<128x32xf32, #tpu.memory_space<vmem>>, vector<128x32xf32>
    tpu.vector_store %arg11[%c0_20, %c0_21], %48 {strides = array<i32>} : memref<128x32xf32, #tpu.memory_space<vmem>>, vector<128x32xf32>,
    %50 = tpu.iota {dimensions = array<i32: 0>} : vector<128x128xi32>
    %51 = vector.broadcast %7 : vector<1x128xi32> to vector<128x128xi32>
    %52 = arith.cmpi eq, %50, %51 : vector<128x128xi32>
    %53 = arith.extui %52 : vector<128x128xi1> to vector<128x128xi32>
    %54 = arith.sitofp %53 : vector<128x128xi32> to vector<128x128xf32>
    %55 = tpu.concatenate %40, %39 in 1 : vector<128x32xf32>, vector<128x32xf32> -> vector<128x64xf32>
    %c0_22 = arith.constant 0 : index
    %c0_23 = arith.constant 0 : index
    %56 = vector.load %arg10[%c0_22, %c0_23] : memref<128x64xf32, #tpu.memory_space<vmem>>, vector<128x64xf32>
    %cst_24 = arith.constant dense<0.000000e+00> : vector<128x64xf32>
    %57 = tpu.matmul %54, %55, %cst_24 {dimension_numbers = #tpu.dot_dimension_numbers<[1], [0], [0], [1], [0, 0, 1, 1], [], []>} : vector<128x128xf32>, vector<128x64xf32>, vector<128x64xf32> -> vector<128x64xf32>
    %58 = arith.addf %56, %57 : vector<128x64xf32>
    %c0_25 = arith.constant 0 : index
    %c0_26 = arith.constant 0 : index
    %59 = vector.load %arg10[%c0_25, %c0_26] : memref<128x64xf32, #tpu.memory_space<vmem>>, vector<128x64xf32>
    tpu.vector_store %arg10[%c0_25, %c0_26], %58 {strides = array<i32>} : memref<128x64xf32, #tpu.memory_space<vmem>>, vector<128x64xf32>,
    return
  }
  func.func @transform_0(%arg0: i32, %arg1: i32) -> (i32, i32) {
    %c1_i32 = arith.constant 1 : i32
    %0 = arith.muli %arg0, %c1_i32 : i32
    %1 = arith.addi %0, %arg1 : i32
    %c0_i32 = arith.constant 0 : i32
    %c0_i32_0 = arith.constant 0 : i32
    return %1, %c0_i32 : i32, i32
  }
  func.func @transform_1(%arg0: i32, %arg1: i32) -> (i32, i32) {
    %c1_i32 = arith.constant 1 : i32
    %0 = arith.muli %arg0, %c1_i32 : i32
    %1 = arith.addi %0, %arg1 : i32
    %c0_i32 = arith.constant 0 : i32
    %c0_i32_0 = arith.constant 0 : i32
    return %c0_i32, %1 : i32, i32
  }
  func.func @transform_2(%arg0: i32, %arg1: i32) -> (i32, i32) {
    %c1_i32 = arith.constant 1 : i32
    %0 = arith.muli %arg0, %c1_i32 : i32
    %1 = arith.addi %0, %arg1 : i32
    %c0_i32 = arith.constant 0 : i32
    %c0_i32_0 = arith.constant 0 : i32
    return %1, %c0_i32 : i32, i32
  }
  func.func @transform_3(%arg0: i32, %arg1: i32) -> (i32, i32) {
    %c0_i32 = arith.constant 0 : i32
    %c0_i32_0 = arith.constant 0 : i32
    %c0_i32_1 = arith.constant 0 : i32
    return %c0_i32, %c0_i32_0 : i32, i32
  }
  func.func @transform_4(%arg0: i32, %arg1: i32) -> (i32, i32) {
    %c0_i32 = arith.constant 0 : i32
    %c0_i32_0 = arith.constant 0 : i32
    %c0_i32_1 = arith.constant 0 : i32
    return %c0_i32, %c0_i32_0 : i32, i32
  }
  func.func @transform_5(%arg0: i32, %arg1: i32) -> (i32, i32) {
    %c0_i32 = arith.constant 0 : i32
    %c0_i32_0 = arith.constant 0 : i32
    %c0_i32_1 = arith.constant 0 : i32
    return %c0_i32, %c0_i32_0 : i32, i32
  }
  func.func @transform_6(%arg0: i32, %arg1: i32) -> (i32, i32) {
    %c0_i32 = arith.constant 0 : i32
    %c0_i32_0 = arith.constant 0 : i32
    %c0_i32_1 = arith.constant 0 : i32
    return %c0_i32, %c0_i32_0 : i32, i32
  }
  func.func @transform_7(%arg0: i32, %arg1: i32) -> (i32, i32) {
    %c0_i32 = arith.constant 0 : i32
    %c0_i32_0 = arith.constant 0 : i32
    %c0_i32_1 = arith.constant 0 : i32
    return %c0_i32, %c0_i32_0 : i32, i32
  }
  func.func @transform_8(%arg0: i32, %arg1: i32) -> (i32, i32) {
    %c0_i32 = arith.constant 0 : i32
    %c0_i32_0 = arith.constant 0 : i32
    return %arg0, %c0_i32 : i32, i32
  }
  func.func @transform_9(%arg0: i32, %arg1: i32) -> (i32, i32) {
    %c1_i32 = arith.constant 1 : i32
    %0 = arith.muli %arg0, %c1_i32 : i32
    %1 = arith.addi %0, %arg1 : i32
    %c0_i32 = arith.constant 0 : i32
    %c0_i32_0 = arith.constant 0 : i32
    return %1, %c0_i32 : i32, i32
  }
}

</mosaic_0001>

<bundles_post_ra>
// kernel: _forward.1
= control target key start
LH: loop header
LB: loop body
LE: loop exit
PB: predicated region body
PF: predicated region fallthrough
CT: control target
= control target key end

     0   :  { %s2649_s30 = smov 0   ;;  %s2651_s10 = smov 0   ;;  %s3570_s0 = inlined_call_operand.vmem [shape: s32[256,2], index: 0, kind: input, shape index: {}]   ;;  %s3571_s1 = inlined_call_operand.vmem [shape: s32[1,256], index: 1, kind: input, shape index: {}]   ;;  %s3572_s2 = inlined_call_operand.vmem [shape: f32[256,32], index: 2, kind: input, shape index: {}]   ;;  %s3573_s3 = inlined_call_operand.vmem [shape: f32[288,64], index: 3, kind: input, shape index: {}]   ;;  %s3574_s4 = inlined_call_operand.vmem [shape: f32[1,32], index: 4, kind: input, shape index: {}]   ;;  %s3575_s5 = inlined_call_operand.vmem [shape: f32[1,32], index: 5, kind: input, shape index: {}]   ;;  %s3576_s6 = inlined_call_operand.vmem [shape: f32[1,32], index: 6, kind: input, shape index: {}]   ;;  %s3577_s7 = inlined_call_operand.vmem [shape: f32[1,32], index: 7, kind: input, shape index: {}]   ;;  %s3578_s8 = inlined_call_operand.vmem [shape: f32[256,64], index: 8, kind: output, shape index: {0}]   ;;  %s3579_s9 = inlined_call_operand.vmem [shape: f32[256,32], index: 9, kind: output, shape index: {1}]  }
   0x1   :  { %s2653_s11 = smov 0  }
   0x2 LB: > { %s32_s12 = sadd.s32 1, %s2587_s10  ;;  %p1978_p0 = scmp.ge.s32.totalorder %s2591_s11, 1  ;;  %s2591_s11 = sphi %s2653_s11, %s20_s11   ;;  %s2587_s10 = sphi %s2651_s10, %s3582_s10   ;;  %s2583_s30 = sphi %s2649_s30, %s3581_s30  }
   0x3   : > { %p34_p1 = scmp.ge.s32.totalorder %s32_s12, 2  ;;  %p336_p2 = scmp.lt.s32.totalorder %s2591_s11, 3 }
   0x5   : > { %s3584_s12 = smov (%p34_p1, %s32_s12), 0  ;;  %p337_p3 = pnand %p1978_p0, %p336_p2 }
   0x6   : > { %s1979_s13 = sshll.u32 (!%p337_p3), %s2583_s30, 4  ;;  %v770_v0 = vld [vmem:[%s3573_s3 + $0x80] sm:$0xff] (!%p337_p3)  ;;  %v771_v1 = vld [vmem:[%s3573_s3 + $0x88] sm:$0xff] (!%p337_p3)  ;;  %v2593_v3 = vmov (!%p337_p3), 0   ;;  %v772_v6 = vld [vmem:[%s3573_s3 + $0x90] sm:$0xff] (!%p337_p3)  ;;  %v2594_v29 = vmov (!%p337_p3), 1  }
   0x7   : > { %340 = sbr.rel (%p337_p3) target bundleno = 976 (0x3d0), region = 52  ;;  %v754_v2 = vld [vmem:[%s3573_s3] sm:$0xff] (!%p337_p3)  ;;  %2430 = vset.pattern.permute.xlu1 (!%p337_p3), %v2593_v3  ;;  %2428 = vset.pattern.permute.xlu0 (!%p337_p3), %v2593_v3  ;;  %p391_p4 = scmp.lt.s32.totalorder (!%p337_p3), %s1979_s13, 31  ;;  %v2326_v4 = vpack.c.bf16 (!%p337_p3), %v771_v1, %v770_v0  ;;  %v755_v5 = vld [vmem:[%s3573_s3 + $0x8] sm:$0xff] (!%p337_p3)  ;;  %v773_v7 = vld [vmem:[%s3573_s3 + $0x98] sm:$0xff] (!%p337_p3)  ;;  %vm790_vm0 = vcmask (!%p337_p3), 261120  }
   0x8   : > { %v2328_v8 = vpack.c.bf16 (!%p337_p3), %v755_v5, %v754_v2  ;;  %v2330_v9 = vpack.c.bf16 (!%p337_p3), %v773_v7, %v772_v6  ;;  %v756_v10 = vld [vmem:[%s3573_s3 + $0x10] sm:$0xff] (!%p337_p3)  ;;  %v757_v11 = vld [vmem:[%s3573_s3 + $0x18] sm:$0xff] (!%p337_p3)  ;;  %v774_v12 = vld [vmem:[%s3573_s3 + $0xa0] sm:$0xff] (!%p337_p3)  ;;  %s2596_s27 = smov (!%p337_p3), 32   ;;  %s2597_s28 = smov (!%p337_p3), 96  }
   0x9   : > { %2327 = vmatprep.subr.bf16.mxu0 (!%p337_p3), %v2326_v4  ;;  %v775_v13 = vld [vmem:[%s3573_s3 + $0xa8] sm:$0xff] (!%p337_p3)  ;;  %v2332_v14 = vpack.c.bf16 (!%p337_p3), %v757_v11, %v756_v10  ;;  %v758_v16 = vld [vmem:[%s3573_s3 + $0x20] sm:$0xff] (!%p337_p3)  ;;  %v776_v20 = vld [vmem:[%s3573_s3 + $0xb0] sm:$0xff] (!%p337_p3)  ;;  %p398_p5 = scmp.lt.s32.totalorder (!%p337_p3), %s2583_s30, 1 }
   0xa   : > { %2329 = vmatpush3.bf16.msra.mxu0 (!%p337_p3), %v2328_v8  ;;  %v2334_v15 = vpack.c.bf16 (!%p337_p3), %v775_v13, %v774_v12  ;;  %v759_v19 = vld [vmem:[%s3573_s3 + $0x28] sm:$0xff] (!%p337_p3)  ;;  %v777_v21 = vld [vmem:[%s3573_s3 + $0xb8] sm:$0xff] (!%p337_p3)  ;;  %v760_v27 = vld [vmem:[%s3573_s3 + $0x30] sm:$0xff] (!%p337_p3) }
   0xb   : > { %2331 = vmatprep.subr.bf16.mxu0 (!%p337_p3), %v2330_v9  ;;  %v2336_v25 = vpack.c.bf16 (!%p337_p3), %v759_v19, %v758_v16  ;;  %v2338_v26 = vpack.c.bf16 (!%p337_p3), %v777_v21, %v776_v20  ;;  %v761_v28 = vld [vmem:[%s3573_s3 + $0x38] sm:$0xff] (!%p337_p3)  ;;  %v778_v30 = vld [vmem:[%s3573_s3 + $0xc0] sm:$0xff] (!%p337_p3)  ;;  %v779_v31 = vld [vmem:[%s3573_s3 + $0xc8] sm:$0xff] (!%p337_p3) }
   0xc   : > { %v2340_v34 = vpack.c.bf16 (!%p337_p3), %v761_v28, %v760_v27  ;;  %v786_v35 = vld [vmem:[%s3573_s3 + $0x100] sm:$0xff] (!%p337_p3)  ;;  %v2342_v36 = vpack.c.bf16 (!%p337_p3), %v779_v31, %v778_v30  ;;  %v763_v38 = vld [vmem:[%s3573_s3 + $0x48] sm:$0xff] (!%p337_p3)  ;;  %v780_v40 = vld [vmem:[%s3573_s3 + $0xd0] sm:$0xff] (!%p337_p3) }
   0xd   : > { %v762_v37 = vld [vmem:[%s3573_s3 + $0x40] sm:$0xff] (!%p337_p3)  ;;  %v787_v39 = vld [vmem:[%s3573_s3 + $0x108] sm:$0xff] (!%p337_p3)  ;;  %v781_v41 = vld [vmem:[%s3573_s3 + $0xd8] sm:$0xff] (!%p337_p3) }
   0xe   : > { %s3586_s13 = smov (!%p391_p4, %s1979_s13), 31  ;;  %2333 = vmatpush3.bf16.msra.mxu0 %v2332_v14  ;;  %v2358_v42 = vpack.c.bf16 %v787_v39, %v786_v35  ;;  %v788_v43 = vld [vmem:[%s3573_s3 + $0x110] sm:$0xff]  ;;  %v789_v45 = vld [vmem:[%s3573_s3 + $0x118] sm:$0xff]  ;;  %v2344_v47 = vpack.c.bf16 %v763_v38, %v762_v37  ;;  %v2346_v49 = vpack.c.bf16 %v781_v41, %v780_v40  ;;  %v782_v53 = vld [vmem:[%s3573_s3 + $0xe0] sm:$0xff]  ;;  %v463_v40 = vlaneseq  ;;  %s3588_s30 = smov (!%p398_p5, %s2583_s30), 1 }
   0xf   : > { %s2700_s18 = sshll.u32 %s3586_s13, 3  ;;  %2335 = vmatprep.subr.bf16.mxu0 %v2334_v15  ;;  %v2362_v48 = vpack.c.bf16 %v789_v45, %v788_v43  ;;  %v764_v50 = vld [vmem:[%s3573_s3 + $0x50] sm:$0xff]  ;;  %v765_v51 = vld [vmem:[%s3573_s3 + $0x58] sm:$0xff]  ;;  %v783_v54 = vld [vmem:[%s3573_s3 + $0xe8] sm:$0xff]  ;;  %s400_s15 = scalar_lea.vmem %s3571_s1, %s3588_s30 }
  0x10   : > { %s2706_s21 = scalar_lea.vmem %s3570_s0, %s2700_s18  ;;  %s2765_s25 = scalar_lea.vmem %s3572_s2, %s2700_s18  ;;  %2359 = vmatprep.subr.bf16.mxu1 %v2358_v42  ;;  %v2348_v57 = vpack.c.bf16 %v765_v51, %v764_v50  ;;  %v2350_v58 = vpack.c.bf16 %v783_v54, %v782_v53  ;;  %v766_v59 = vld [vmem:[%s3573_s3 + $0x60] sm:$0xff]  ;;  %v767_v60 = vld [vmem:[%s3573_s3 + $0x68] sm:$0xff]  ;;  %v784_v61 = vld [vmem:[%s3573_s3 + $0xf0] sm:$0xff]  ;;  %v2841_v43 = vand.u32 127, %v463_v40 }
  0x11   : > { %v447_v17 = vld [vmem:[%s2706_s21 + $0x8] sm:$0xff]  ;;  %v446_v18 = vld [vmem:[%s2706_s21] sm:$0xff]  ;;  %v448_v24 = vld [vmem:[%s2706_s21 + $0x10] sm:$0xff]  ;;  %2361 = vmatpush3.bf16.msra.mxu1 %v2358_v42  ;;  %v2352_v2 = vpack.c.bf16 %v767_v60, %v766_v59  ;;  %s2999_s13 = scalar_lea.vmem %s3579_s9, %s2700_s18 }
  0x12   : > { %470 = vperm.xlu1 %2430, %v447_v17   ;;  %467 = vperm.xlu0 %2428, %v446_v18   ;;  %v547_v22 = vadd.s32 128, %v447_v17  ;;  %v546_v23 = vadd.s32 128, %v446_v18  ;;  %v548_v32 = vadd.s32 128, %v448_v24  ;;  %v449_v33 = vld [vmem:[%s2706_s21 + $0x18] sm:$0xff]  ;;  %v450_v46 = vld [vmem:[%s2706_s21 + $0x20] sm:$0xff]  ;;  %v451_v56 = vld [vmem:[%s2706_s21 + $0x28] sm:$0xff] }
  0x13   : > { %2337 = vmatpush3.bf16.msra.mxu0 %v2336_v25  ;;  %v549_v44 = vadd.s32 128, %v449_v33  ;;  %v738_v52 = vld [vmem:[%s2765_s25] sm:$0xff]  ;;  %v550_v55 = vadd.s32 128, %v450_v46  ;;  %2363 = vmatprep.subr.bf16.mxu1 %v2362_v48  ;;  %v785_v62 = vld [vmem:[%s3573_s3 + $0xf8] sm:$0xff]  ;;  %v739_v63 = vld [vmem:[%s2765_s25 + $0x8] sm:$0xff]  ;;  %v551_v0 = vadd.s32 128, %v451_v56 }
  0x14   : > { %2339 = vmatprep.subr.bf16.mxu0 %v2338_v26  ;;  %2246 = vmatprep.mubr.msk.f32.mxu1 %vm790_vm0, %v738_v52  ;;  %v452_v1 = vld [vmem:[%s2706_s21 + $0x30] sm:$0xff]  ;;  %v769_v5 = vld [vmem:[%s3573_s3 + $0x78] sm:$0xff]  ;;  %v454_v12 = vld [vmem:[%s2706_s21 + $0x40] sm:$0xff] }
  0x15   : > { %2365 = vmatpush3.bf16.msra.mxu1 %v2362_v48  ;;  %v768_v4 = vld [vmem:[%s3573_s3 + $0x70] sm:$0xff]  ;;  %v741_v7 = vld [vmem:[%s2765_s25 + $0x18] sm:$0xff]  ;;  %v552_v8 = vadd.s32 128, %v452_v1  ;;  %v742_v13 = vld [vmem:[%s2765_s25 + $0x20] sm:$0xff]  ;;  %v554_v15 = vadd.s32 128, %v454_v12 }
  0x16   : > { %2431 = vset.pattern.permute.xlu1 %v2594_v29  ;;  %2429 = vset.pattern.permute.xlu0 %v2594_v29  ;;  %v740_v6 = vld [vmem:[%s2765_s25 + $0x10] sm:$0xff]  ;;  %v453_v9 = vld [vmem:[%s2706_s21 + $0x38] sm:$0xff]  ;;  %v2356_v10 = vpack.c.bf16 %v769_v5, %v768_v4  ;;  %v743_v14 = vld [vmem:[%s2765_s25 + $0x28] sm:$0xff] }
  0x17   : > { %566 = vperm.xlu1 %2431, %v547_v22   ;;  %563 = vperm.xlu0 %2429, %v546_v23   ;;  %v553_v11 = vadd.s32 128, %v453_v9  ;;  %v455_v16 = vld [vmem:[%s2706_s21 + $0x48] sm:$0xff]  ;;  %v456_v18 = vld [vmem:[%s2706_s21 + $0x50] sm:$0xff]  ;;  %v745_v20 = vld [vmem:[%s2765_s25 + $0x38] sm:$0xff] }
  0x18   : > { %2341 = vmatpush3.bf16.msra.mxu0 %v2340_v34  ;;  %2247 = vmatmul.mubr.msk.f32.vlgmr.msra.gmra.mrb[0].mxu1 %vm790_vm0, %v739_v63  ;;  %v555_v17 = vadd.s32 128, %v455_v16  ;;  %v744_v19 = vld [vmem:[%s2765_s25 + $0x30] sm:$0xff]  ;;  %v556_v21 = vadd.s32 128, %v456_v18  ;;  %v457_v22 = vld [vmem:[%s2706_s21 + $0x58] sm:$0xff]  ;;  %v746_v25 = vld [vmem:[%s2765_s25 + $0x40] sm:$0xff] }
  0x19   : > { %2343 = vmatprep.subr.bf16.mxu0 %v2342_v36  ;;  %2249 = vmatprep.mubr.msk.f32.mxu1 %vm790_vm0, %v740_v6  ;;  %v557_v23 = vadd.s32 128, %v457_v22  ;;  %v747_v26 = vld [vmem:[%s2765_s25 + $0x48] sm:$0xff]  ;;  %v460_v30 = vld [vmem:[%s2706_s21 + $0x70] sm:$0xff]  ;;  %v461_v34 = vld [vmem:[%s2706_s21 + $0x78] sm:$0xff] }
  0x1a   : > { %v459_v28 = vld [vmem:[%s2706_s21 + $0x68] sm:$0xff]  ;;  %v748_v31 = vld [vmem:[%s2765_s25 + $0x50] sm:$0xff]  ;;  %v561_v35 = vadd.s32 128, %v461_v34  ;;  %v750_v36 = vld [vmem:[%s2765_s25 + $0x60] sm:$0xff] }
  0x1b   : > { %2432 = vset.pattern.permute.xlu1 %v2593_v3  ;;  %569 = vperm.xlu0 %2429, %v548_v32   ;;  %v2354_v3 = vpack.c.bf16 %v785_v62, %v784_v61  ;;  %v559_v29 = vadd.s32 128, %v459_v28  ;;  %v749_v32 = vld [vmem:[%s2765_s25 + $0x58] sm:$0xff]  ;;  %v751_v37 = vld [vmem:[%s2765_s25 + $0x68] sm:$0xff]  ;;  %v752_v38 = vld [vmem:[%s2765_s25 + $0x70] sm:$0xff] }
  0x1c   : > { %473 = vperm.xlu1 %2432, %v448_v24   ;;  %2345 = vmatpush3.bf16.msra.mxu0 %v2344_v47  ;;  %v458_v24 = vld [vmem:[%s2706_s21 + $0x60] sm:$0xff]  ;;  %v753_v39 = vld [vmem:[%s2765_s25 + $0x78] sm:$0xff]  ;;  %s3383_s25 = scalar_lea.vmem %s3578_s8, %s2700_s18 }
  0x1d   : > { %2347 = vmatprep.subr.bf16.mxu0 %v2346_v49  ;;  %2250 = vmatmul.mubr.msk.f32.gmra.mrb[2].mxu1 %vm790_vm0, %v741_v7  ;;  %v558_v27 = vadd.s32 128, %v458_v24  ;;  %v2595_v49 = vmov 1.0  }
  0x1e   : > { %2252 = vmatprep.mubr.msk.f32.mxu1 %vm790_vm0, %v742_v13 }
  0x1f   : > { %572 = vperm.xlu0 %2429, %v549_v44   ;;  %v2844_v44 = vadd.s32 128, %v2841_v43 }
  0x20   : > { %476 = vperm.xlu1 %2432, %v449_v33   ;;  %2349 = vmatpush3.bf16.msra.mxu0 %v2348_v57  ;;  %v560_v33 = vadd.s32 128, %v460_v30 }
  0x21   : > { %2351 = vmatprep.subr.bf16.mxu0 %v2350_v58  ;;  %2253 = vmatmul.mubr.msk.f32.gmra.mrb[4].mxu1 %vm790_vm0, %v743_v14 }
  0x22   : > { %2255 = vmatprep.mubr.msk.f32.mxu1 %vm790_vm0, %v744_v19 }
  0x23   : > { %575 = vperm.xlu0 %2429, %v550_v55  }
  0x24   : > { %479 = vperm.xlu1 %2432, %v450_v46   ;;  %2353 = vmatpush3.bf16.msra.mxu0 %v2352_v2 }
  0x25   : > { %2355 = vmatprep.subr.bf16.mxu0 %v2354_v3  ;;  %2256 = vmatmul.mubr.msk.f32.gmra.mrb[6].mxu1 %vm790_vm0, %v745_v20 }
  0x26   : > { %2258 = vmatprep.mubr.msk.f32.mxu1 %vm790_vm0, %v746_v25 }
  0x27   : > { %578 = vperm.xlu0 %2429, %v551_v0  }
  0x28   : > { %482 = vperm.xlu1 %2432, %v451_v56   ;;  %2357 = vmatpush3.bf16.msra.mxu0 %v2356_v10 }
  0x29   : > { %2259 = vmatmul.mubr.msk.f32.gmra.mrb[8].mxu1 %vm790_vm0, %v747_v26 }
  0x2a   : > { %2261 = vmatprep.mubr.msk.f32.mxu1 %vm790_vm0, %v748_v31  ;;  %v2967_v31 = vld [vmem:[%s3574_s4] ss:$0 sm:$0xff] }
  0x2b   : > { %581 = vperm.xlu0 %2429, %v552_v8  }
  0x2c   : > { %485 = vperm.xlu1 %2432, %v452_v1  }
  0x2d   : > { %2262 = vmatmul.mubr.msk.f32.gmra.mrb[10].mxu1 %vm790_vm0, %v749_v32 }
  0x2e   : > { %2264 = vmatprep.mubr.msk.f32.mxu1 %vm790_vm0, %v750_v36 }
  0x2f   : > { %584 = vperm.xlu0 %2429, %v553_v11  }
  0x30   : > { %488 = vperm.xlu1 %2432, %v453_v9  }
  0x31   : > { %2265 = vmatmul.mubr.msk.f32.gmra.mrb[12].mxu1 %vm790_vm0, %v751_v37 }
  0x32   : > { %2267 = vmatprep.mubr.msk.f32.mxu1 %vm790_vm0, %v752_v38  ;;  %v2983_v38 = vld [vmem:[%s3577_s7] ss:$0 sm:$0xff] }
  0x33   : > { %587 = vperm.xlu0 %2429, %v554_v15  }
  0x34   : > { %491 = vperm.xlu1 %2432, %v454_v12  }
  0x35   : > { %2268 = vmatmul.mubr.msk.f32.gmra.mrb[14].mxu1 %vm790_vm0, %v753_v39 }
  0x37   : > { %590 = vperm.xlu0 %2429, %v555_v17  }
  0x38   : > { %494 = vperm.xlu1 %2432, %v455_v16  }
  0x3b   : > { %593 = vperm.xlu0 %2429, %v556_v21  }
  0x3c   : > { %497 = vperm.xlu1 %2432, %v456_v18  }
  0x3f   : > { %596 = vperm.xlu0 %2429, %v557_v23  }
  0x40   : > { %500 = vperm.xlu1 %2432, %v457_v22  }
  0x43   : > { %599 = vperm.xlu0 %2429, %v558_v27  }
  0x44   : > { %503 = vperm.xlu1 %2432, %v458_v24  }
  0x47   : > { %602 = vperm.xlu0 %2429, %v559_v29  }
  0x48   : > { %506 = vperm.xlu1 %2432, %v459_v28  }
  0x4b   : > { %605 = vperm.xlu0 %2429, %v560_v33  }
  0x4c   : > { %509 = vperm.xlu1 %2432, %v460_v30  }
  0x4f   : > { %608 = vperm.xlu0 %2429, %v561_v35  }
  0x50   : > { %512 = vperm.xlu1 %2432, %v461_v34   ;;  %v2974_v34 = vld [vmem:[%s3576_s6] ss:$0 sm:$0xff] }
  0x91   : > { %v468_v41 = vpop.permute.xlu0 %467  ;;  %v471_v42 = vpop.permute.xlu1 %470 }
  0x92   : > { %vm514_vm3 = vcmp.eq.s32.totalorder %v2841_v43, %v468_v41  ;;  %vm515_vm6 = vcmp.eq.s32.totalorder %v2844_v44, %v468_v41  ;;  %vm517_vm8 = vcmp.eq.s32.totalorder %v2844_v44, %v471_v42  ;;  %vm516_vm13 = vcmp.eq.s32.totalorder %v2841_v43, %v471_v42 }
  0x96   : > { %v567_v45 = vpop.permute.xlu1 %566  ;;  %v564_v46 = vpop.permute.xlu0 %563 }
  0x97   : > { %vm610_vm1 = vcmp.eq.s32.totalorder %v2841_v43, %v564_v46  ;;  %vm611_vm2 = vcmp.eq.s32.totalorder %v2844_v44, %v564_v46  ;;  %vm613_vm4 = vcmp.eq.s32.totalorder %v2844_v44, %v567_v45  ;;  %vm612_vm11 = vcmp.eq.s32.totalorder %v2841_v43, %v567_v45 }
  0x98   : > { %vm642_vm5 = vmor %vm514_vm3, %vm610_vm1 }
  0x99   : > { %vm643_vm7 = vmor %vm515_vm6, %vm611_vm2 }
  0x9a   : > { %v570_v47 = vpop.permute.xlu0 %569  ;;  %2019 = vmatprep.mubr.msk.f32.mxu0 %vm643_vm7, %v2595_v49  ;;  %vm645_vm12 = vmor %vm517_vm8, %vm613_vm4 }
  0x9b   : > { %v474_v48 = vpop.permute.xlu1 %473  ;;  %vm615_vm9 = vcmp.eq.s32.totalorder %v2844_v44, %v570_v47  ;;  %2020 = vmatmul.mubr.msk.f32.vlgmr.msra.gmra.mrb[0].mxu0 %vm642_vm5, %v2595_v49  ;;  %vm644_vm15 = vmor %vm516_vm13, %vm612_vm11  ;;  %vm614_vm3 = vcmp.eq.s32.totalorder %v2841_v43, %v570_v47 }
  0x9c   : > { %vm519_vm10 = vcmp.eq.s32.totalorder %v2844_v44, %v474_v48  ;;  %2021 = vmatprep.mubr.msk.f32.mxu0 %vm645_vm12, %v2595_v49  ;;  %vm518_vm6 = vcmp.eq.s32.totalorder %v2841_v43, %v474_v48 }
  0x9d   : > { %vm647_vm14 = vmor %vm519_vm10, %vm615_vm9 }
  0x9e   : > { %v573_v50 = vpop.permute.xlu0 %572  ;;  %vm646_vm5 = vmor %vm518_vm6, %vm614_vm3 }
  0x9f   : > { %v477_v51 = vpop.permute.xlu1 %476  ;;  %vm617_vm1 = vcmp.eq.s32.totalorder %v2844_v44, %v573_v50  ;;  %2022 = vmatmul.mubr.msk.f32.gmra.mrb[2].mxu0 %vm644_vm15, %v2595_v49  ;;  %vm616_vm9 = vcmp.eq.s32.totalorder %v2841_v43, %v573_v50 }
  0xa0   : > { %vm521_vm2 = vcmp.eq.s32.totalorder %v2844_v44, %v477_v51  ;;  %2023 = vmatprep.mubr.msk.f32.mxu0 %vm647_vm14, %v2595_v49  ;;  %vm520_vm10 = vcmp.eq.s32.totalorder %v2841_v43, %v477_v51 }
  0xa1   : > { %vm649_vm4 = vmor %vm521_vm2, %vm617_vm1 }
  0xa2   : > { %v576_v52 = vpop.permute.xlu0 %575  ;;  %vm648_vm12 = vmor %vm520_vm10, %vm616_vm9 }
  0xa3   : > { %v480_v53 = vpop.permute.xlu1 %479  ;;  %vm619_vm7 = vcmp.eq.s32.totalorder %v2844_v44, %v576_v52  ;;  %2024 = vmatmul.mubr.msk.f32.gmra.mrb[4].mxu0 %vm646_vm5, %v2595_v49  ;;  %vm618_vm15 = vcmp.eq.s32.totalorder %v2841_v43, %v576_v52 }
  0xa4   : > { %vm523_vm8 = vcmp.eq.s32.totalorder %v2844_v44, %v480_v53  ;;  %2025 = vmatprep.mubr.msk.f32.mxu0 %vm649_vm4, %v2595_v49  ;;  %vm522_vm1 = vcmp.eq.s32.totalorder %v2841_v43, %v480_v53 }
  0xa5   : > { %vm651_vm11 = vmor %vm523_vm8, %vm619_vm7 }
  0xa6   : > { %v579_v54 = vpop.permute.xlu0 %578  ;;  %vm650_vm3 = vmor %vm522_vm1, %vm618_vm15 }
  0xa7   : > { %v483_v55 = vpop.permute.xlu1 %482  ;;  %vm621_vm13 = vcmp.eq.s32.totalorder %v2844_v44, %v579_v54  ;;  %2026 = vmatmul.mubr.msk.f32.gmra.mrb[6].mxu0 %vm648_vm12, %v2595_v49  ;;  %vm620_vm5 = vcmp.eq.s32.totalorder %v2841_v43, %v579_v54 }
  0xa8   : > { %vm525_vm14 = vcmp.eq.s32.totalorder %v2844_v44, %v483_v55  ;;  %2027 = vmatprep.mubr.msk.f32.mxu0 %vm651_vm11, %v2595_v49  ;;  %vm524_vm7 = vcmp.eq.s32.totalorder %v2841_v43, %v483_v55 }
  0xa9   : > { %vm653_vm2 = vmor %vm525_vm14, %vm621_vm13 }
  0xaa   : > { %v582_v56 = vpop.permute.xlu0 %581  ;;  %vm652_vm9 = vmor %vm524_vm7, %vm620_vm5 }
  0xab   : > { %v486_v57 = vpop.permute.xlu1 %485  ;;  %vm623_vm6 = vcmp.eq.s32.totalorder %v2844_v44, %v582_v56  ;;  %2028 = vmatmul.mubr.msk.f32.gmra.mrb[8].mxu0 %vm650_vm3, %v2595_v49  ;;  %vm622_vm12 = vcmp.eq.s32.totalorder %v2841_v43, %v582_v56 }
  0xac   : > { %vm527_vm4 = vcmp.eq.s32.totalorder %v2844_v44, %v486_v57  ;;  %2029 = vmatprep.mubr.msk.f32.mxu0 %vm653_vm2, %v2595_v49  ;;  %vm526_vm13 = vcmp.eq.s32.totalorder %v2841_v43, %v486_v57 }
  0xad   : > { %vm655_vm8 = vmor %vm527_vm4, %vm623_vm6 }
  0xae   : > { %v585_v58 = vpop.permute.xlu0 %584  ;;  %vm654_vm15 = vmor %vm526_vm13, %vm622_vm12 }
  0xaf   : > { %v489_v59 = vpop.permute.xlu1 %488  ;;  %vm625_vm10 = vcmp.eq.s32.totalorder %v2844_v44, %v585_v58  ;;  %2030 = vmatmul.mubr.msk.f32.gmra.mrb[10].mxu0 %vm652_vm9, %v2595_v49  ;;  %vm624_vm3 = vcmp.eq.s32.totalorder %v2841_v43, %v585_v58 }
  0xb0   : > { %vm529_vm11 = vcmp.eq.s32.totalorder %v2844_v44, %v489_v59  ;;  %2031 = vmatprep.mubr.msk.f32.mxu0 %vm655_vm8, %v2595_v49  ;;  %vm528_vm6 = vcmp.eq.s32.totalorder %v2841_v43, %v489_v59 }
  0xb1   : > { %vm657_vm14 = vmor %vm529_vm11, %vm625_vm10 }
  0xb2   : > { %v588_v60 = vpop.permute.xlu0 %587  ;;  %vm656_vm5 = vmor %vm528_vm6, %vm624_vm3 }
  0xb3   : > { %v492_v61 = vpop.permute.xlu1 %491  ;;  %vm627_vm1 = vcmp.eq.s32.totalorder %v2844_v44, %v588_v60  ;;  %2032 = vmatmul.mubr.msk.f32.gmra.mrb[12].mxu0 %vm654_vm15, %v2595_v49  ;;  %vm626_vm9 = vcmp.eq.s32.totalorder %v2841_v43, %v588_v60 }
  0xb4   : > { %vm531_vm2 = vcmp.eq.s32.totalorder %v2844_v44, %v492_v61  ;;  %2033 = vmatprep.mubr.msk.f32.mxu0 %vm657_vm14, %v2595_v49  ;;  %vm530_vm10 = vcmp.eq.s32.totalorder %v2841_v43, %v492_v61 }
  0xb5   : > { %vm659_vm4 = vmor %vm531_vm2, %vm627_vm1 }
  0xb6   : > { %v591_v62 = vpop.permute.xlu0 %590  ;;  %vm658_vm12 = vmor %vm530_vm10, %vm626_vm9 }
  0xb7   : > { %v495_v63 = vpop.permute.xlu1 %494  ;;  %vm629_vm7 = vcmp.eq.s32.totalorder %v2844_v44, %v591_v62  ;;  %2034 = vmatmul.mubr.msk.f32.gmra.mrb[14].mxu0 %vm656_vm5, %v2595_v49  ;;  %vm628_vm15 = vcmp.eq.s32.totalorder %v2841_v43, %v591_v62 }
  0xb8   : > { %vm533_vm8 = vcmp.eq.s32.totalorder %v2844_v44, %v495_v63  ;;  %2035 = vmatprep.mubr.msk.f32.mxu0 %vm659_vm4, %v2595_v49  ;;  %vm532_vm1 = vcmp.eq.s32.totalorder %v2841_v43, %v495_v63 }
  0xb9   : > { %vm661_vm11 = vmor %vm533_vm8, %vm629_vm7 }
  0xba   : > { %v594_v0 = vpop.permute.xlu0 %593  ;;  %vm660_vm3 = vmor %vm532_vm1, %vm628_vm15 }
  0xbb   : > { %v498_v1 = vpop.permute.xlu1 %497  ;;  %vm631_vm13 = vcmp.eq.s32.totalorder %v2844_v44, %v594_v0  ;;  %2036 = vmatmul.mubr.msk.f32.gmra.mrb[16].mxu0 %vm658_vm12, %v2595_v49  ;;  %vm630_vm5 = vcmp.eq.s32.totalorder %v2841_v43, %v594_v0 }
  0xbc   : > { %vm535_vm14 = vcmp.eq.s32.totalorder %v2844_v44, %v498_v1  ;;  %2037 = vmatprep.mubr.msk.f32.mxu0 %vm661_vm11, %v2595_v49  ;;  %vm534_vm7 = vcmp.eq.s32.totalorder %v2841_v43, %v498_v1 }
  0xbd   : > { %vm663_vm2 = vmor %vm535_vm14, %vm631_vm13 }
  0xbe   : > { %v597_v2 = vpop.permute.xlu0 %596  ;;  %vm662_vm9 = vmor %vm534_vm7, %vm630_vm5 }
  0xbf   : > { %v501_v3 = vpop.permute.xlu1 %500  ;;  %vm633_vm6 = vcmp.eq.s32.totalorder %v2844_v44, %v597_v2  ;;  %2038 = vmatmul.mubr.msk.f32.gmra.mrb[18].mxu0 %vm660_vm3, %v2595_v49  ;;  %vm632_vm12 = vcmp.eq.s32.totalorder %v2841_v43, %v597_v2 }
  0xc0   : > { %vm537_vm4 = vcmp.eq.s32.totalorder %v2844_v44, %v501_v3  ;;  %2039 = vmatprep.mubr.msk.f32.mxu0 %vm663_vm2, %v2595_v49  ;;  %vm536_vm13 = vcmp.eq.s32.totalorder %v2841_v43, %v501_v3 }
  0xc1   : > { %vm665_vm8 = vmor %vm537_vm4, %vm633_vm6 }
  0xc2   : > { %v600_v4 = vpop.permute.xlu0 %599  ;;  %vm664_vm15 = vmor %vm536_vm13, %vm632_vm12 }
  0xc3   : > { %v504_v5 = vpop.permute.xlu1 %503  ;;  %vm635_vm10 = vcmp.eq.s32.totalorder %v2844_v44, %v600_v4  ;;  %2040 = vmatmul.mubr.msk.f32.gmra.mrb[20].mxu0 %vm662_vm9, %v2595_v49  ;;  %vm634_vm3 = vcmp.eq.s32.totalorder %v2841_v43, %v600_v4 }
  0xc4   : > { %vm539_vm11 = vcmp.eq.s32.totalorder %v2844_v44, %v504_v5  ;;  %2041 = vmatprep.mubr.msk.f32.mxu0 %vm665_vm8, %v2595_v49  ;;  %vm538_vm6 = vcmp.eq.s32.totalorder %v2841_v43, %v504_v5 }
  0xc5   : > { %vm667_vm14 = vmor %vm539_vm11, %vm635_vm10 }
  0xc6   : > { %v603_v6 = vpop.permute.xlu0 %602  ;;  %vm666_vm5 = vmor %vm538_vm6, %vm634_vm3 }
  0xc7   : > { %v507_v7 = vpop.permute.xlu1 %506  ;;  %vm637_vm1 = vcmp.eq.s32.totalorder %v2844_v44, %v603_v6  ;;  %2042 = vmatmul.mubr.msk.f32.gmra.mrb[22].mxu0 %vm664_vm15, %v2595_v49  ;;  %vm636_vm9 = vcmp.eq.s32.totalorder %v2841_v43, %v603_v6 }
  0xc8   : > { %vm541_vm2 = vcmp.eq.s32.totalorder %v2844_v44, %v507_v7  ;;  %2043 = vmatprep.mubr.msk.f32.mxu0 %vm667_vm14, %v2595_v49  ;;  %vm540_vm10 = vcmp.eq.s32.totalorder %v2841_v43, %v507_v7 }
  0xc9   : > { %vm669_vm4 = vmor %vm541_vm2, %vm637_vm1 }
  0xca   : > { %v606_v8 = vpop.permute.xlu0 %605  ;;  %vm668_vm12 = vmor %vm540_vm10, %vm636_vm9 }
  0xcb   : > { %v510_v9 = vpop.permute.xlu1 %509  ;;  %vm639_vm7 = vcmp.eq.s32.totalorder %v2844_v44, %v606_v8  ;;  %2044 = vmatmul.mubr.msk.f32.gmra.mrb[24].mxu0 %vm666_vm5, %v2595_v49  ;;  %vm638_vm15 = vcmp.eq.s32.totalorder %v2841_v43, %v606_v8 }
  0xcc   : > { %vm543_vm8 = vcmp.eq.s32.totalorder %v2844_v44, %v510_v9  ;;  %2045 = vmatprep.mubr.msk.f32.mxu0 %vm669_vm4, %v2595_v49  ;;  %vm542_vm1 = vcmp.eq.s32.totalorder %v2841_v43, %v510_v9 }
  0xcd   : > { %vm671_vm11 = vmor %vm543_vm8, %vm639_vm7 }
  0xce   : > { %v609_v10 = vpop.permute.xlu0 %608  ;;  %vm670_vm3 = vmor %vm542_vm1, %vm638_vm15 }
  0xcf   : > { %v513_v11 = vpop.permute.xlu1 %512  ;;  %vm641_vm13 = vcmp.eq.s32.totalorder %v2844_v44, %v609_v10  ;;  %2046 = vmatmul.mubr.msk.f32.gmra.mrb[26].mxu0 %vm668_vm12, %v2595_v49  ;;  %vm640_vm6 = vcmp.eq.s32.totalorder %v2841_v43, %v609_v10 }
  0xd0   : > { %vm545_vm14 = vcmp.eq.s32.totalorder %v2844_v44, %v513_v11  ;;  %2047 = vmatprep.mubr.msk.f32.mxu0 %vm671_vm11, %v2595_v49  ;;  %vm544_vm4 = vcmp.eq.s32.totalorder %v2841_v43, %v513_v11 }
  0xd1   : > { %vm673_vm2 = vmor %vm545_vm14, %vm641_vm13 }
  0xd2   : > { %vm672_vm5 = vmor %vm544_vm4, %vm640_vm6  ;;  %vm428_vm4 = vcmask 523264  }
  0xd3   : > { %2048 = vmatmul.mubr.msk.f32.gmra.mrb[28].mxu0 %vm670_vm3, %v2595_v49 }
  0xd4   : > { %2049 = vmatprep.mubr.msk.f32.mxu0 %vm673_vm2, %v2595_v49 }
  0xd7   : > { %2050 = vmatmul.mubr.msk.f32.gmra.mrb[30].mxu0 %vm672_vm5, %v2595_v49 }
  0xeb   : > { %v2248_v12 = vpop.f32.mrb[0].mxu1 }
  0xec   : > { %v1050_v13 = vpop.f32.mrb[1].mxu1 }
  0xf0   : > { %v2251_v14 = vpop.f32.mrb[2].mxu1 }
  0xf1   : > { %v1060_v15 = vpop.f32.mrb[3].mxu1 }
  0xf4   : > { %v2942_v16 = vpop.f32.mrb[4].mxu1 }
  0xf5   : > { %v1070_v17 = vpop.f32.mrb[5].mxu1 }
  0xf8   : > { %v2944_v18 = vpop.f32.mrb[6].mxu1 }
  0xf9   : > { %v2946_v19 = vpop.f32.mrb[7].mxu1 }
  0xfc   : > { %v2948_v20 = vpop.f32.mrb[8].mxu1 }
  0xfd   : > { %v2950_v21 = vpop.f32.mrb[9].mxu1 }
 0x100   : > { %v2952_v22 = vpop.f32.mrb[10].mxu1 }
 0x101   : > { %v2954_v23 = vpop.f32.mrb[11].mxu1 }
 0x104   : > { %v2956_v24 = vpop.f32.mrb[12].mxu1 }
 0x105   : > { %v2958_v25 = vpop.f32.mrb[13].mxu1 }
 0x108   : > { %v2960_v26 = vpop.f32.mrb[14].mxu1 }
 0x109   : > { %v2962_v27 = vpop.f32.mrb[15].mxu1 }
 0x16e   : > { %v2138_v28 = vpop.f32.mrb[0].mxu0 }
 0x16f   : > { %v2139_v29 = vpop.f32.mrb[1].mxu0 }
 0x170   : > { %v2140_v30 = vadd.f32 %v2139_v29, %v2138_v28 }
 0x172   : > { %v2969_v32 = vadd.f32 %v2140_v30, %v1050_v13  ;;  %v2141_v33 = vpop.f32.mrb[2].mxu0 }
 0x173   : > { %v2142_v35 = vpop.f32.mrb[3].mxu0 }
 0x174   : > { %v2978_v36 = vadd.f32 %v2967_v31, %v2969_v32  ;;  %v2143_v37 = vadd.f32 %v2142_v35, %v2141_v33 }
 0x176   : > { %v1168_v39 = vand.u32 2147483647, %v2978_v36  ;;  %v1437_v41 = vmul.f32 %v2974_v34, %v2978_v36  ;;  %v2988_v42 = vadd.f32 %v2248_v12, %v2143_v37  ;;  %v2144_v43 = vpop.f32.mrb[4].mxu0 }
 0x177   : > { %v2145_v44 = vpop.f32.mrb[5].mxu0 }
 0x178   : > { %v1184_v45 = vsub.f32 0.0, %v1168_v39  ;;  %v1460_v46 = vadd.f32 %v2983_v38, %v1437_v41  ;;  %v2993_v47 = vadd.f32 %v2967_v31, %v2988_v42  ;;  %v2146_v48 = vadd.f32 %v2145_v44, %v2144_v43 }
 0x17a   : > { %v1200_v50 = vmul.f32 1.442695, %v1184_v45  ;;  %v1476_v51 = vmax.f32 %v1460_v46, 0.0  ;;  %v1169_v52 = vand.u32 2147483647, %v2993_v47  ;;  %v1438_v53 = vmul.f32 %v2974_v34, %v2993_v47  ;;  %v2147_v55 = vpop.f32.mrb[6].mxu0 }
 0x17b   : > { %v3004_v54 = vadd.f32 %v2146_v48, %v1060_v15  ;;  %v2148_v57 = vpop.f32.mrb[7].mxu0 }
 0x17c   : > { %2473 = vpow2.f32 %v1200_v50  ;;  %1492 = vst.msk [vmem:[%s2999_s13] sm:$0xff] %vm790_vm0, %v1476_v51  ;;  %v1185_v56 = vsub.f32 0.0, %v1169_v52  ;;  %v1461_v58 = vadd.f32 %v2983_v38, %v1438_v53  ;;  %v2149_v60 = vadd.f32 %v2148_v57, %v2147_v55 }
 0x17d   : > { %v3011_v59 = vadd.f32 %v2967_v31, %v3004_v54 }
 0x17e   : > { %v1202_v61 = vmul.f32 1.442695, %v1185_v56  ;;  %v2150_v62 = vpop.f32.mrb[8].mxu0  ;;  %v1477_v63 = vmax.f32 %v1461_v58, 0.0  ;;  %v3016_v3 = vadd.f32 %v2251_v14, %v2149_v60 }
 0x17f   : > { %v1170_v0 = vand.u32 2147483647, %v3011_v59  ;;  %v1439_v1 = vmul.f32 %v2974_v34, %v3011_v59  ;;  %v2151_v2 = vpop.f32.mrb[9].mxu0 }
 0x180   : > { %2475 = vpow2.f32 %v1202_v61  ;;  %v2152_v4 = vadd.f32 %v2151_v2, %v2150_v62  ;;  %1493 = vst.msk [vmem:[%s2999_s13 + $0x8] sm:$0xff] %vm790_vm0, %v1477_v63  ;;  %v3023_v7 = vadd.f32 %v2967_v31, %v3016_v3 }
 0x181   : > { %v1186_v5 = vsub.f32 0.0, %v1170_v0  ;;  %v1462_v6 = vadd.f32 %v2983_v38, %v1439_v1 }
 0x182   : > { %v3025_v8 = vadd.f32 %v2152_v4, %v1070_v17  ;;  %v2153_v9 = vpop.f32.mrb[10].mxu0  ;;  %v1171_v13 = vand.u32 2147483647, %v3023_v7  ;;  %v1440_v14 = vmul.f32 %v2974_v34, %v3023_v7 }
 0x183   : > { %v1204_v10 = vmul.f32 1.442695, %v1186_v5  ;;  %v1478_v11 = vmax.f32 %v1462_v6, 0.0  ;;  %v2154_v12 = vpop.f32.mrb[11].mxu0 }
 0x184   : > { %v3032_v15 = vadd.f32 %v2967_v31, %v3025_v8  ;;  %v2155_v28 = vadd.f32 %v2154_v12, %v2153_v9  ;;  %v1187_v17 = vsub.f32 0.0, %v1171_v13  ;;  %v1463_v30 = vadd.f32 %v2983_v38, %v1440_v14 }
 0x185   : > { %2477 = vpow2.f32 %v1204_v10  ;;  %1494 = vst.msk [vmem:[%s2999_s13 + $0x10] sm:$0xff] %vm790_vm0, %v1478_v11 }
 0x186   : > { %v2474_v29 = vpop.eup %2473  ;;  %v1172_v33 = vand.u32 2147483647, %v3032_v15  ;;  %v2156_v35 = vpop.f32.mrb[12].mxu0  ;;  %v1441_v39 = vmul.f32 %v2974_v34, %v3032_v15  ;;  %v3041_v41 = vadd.f32 %v2942_v16, %v2155_v28  ;;  %v1206_v44 = vmul.f32 1.442695, %v1187_v17 }
 0x187   : > { %v1232_v37 = vadd.f32 1.0, %v2474_v29  ;;  %v2157_v43 = vpop.f32.mrb[13].mxu0  ;;  %v1479_v45 = vmax.f32 %v1463_v30, 0.0 }
 0x188   : > { %v1188_v46 = vsub.f32 0.0, %v1172_v33  ;;  %v2158_v48 = vadd.f32 %v2157_v43, %v2156_v35  ;;  %v1464_v50 = vadd.f32 %v2983_v38, %v1441_v39  ;;  %v3046_v51 = vadd.f32 %v2967_v31, %v3041_v41 }
 0x189   : > { %2479 = vlog2.f32 %v1232_v37  ;;  %1495 = vst.msk [vmem:[%s2999_s13 + $0x18] sm:$0xff] %vm790_vm0, %v1479_v45  ;;  %v1152_v45 = vmin.f32 %v2978_v36, 0.0 }
 0x18a   : > { %v2476_v52 = vpop.eup %2475  ;;  %2481 = vpow2.f32 %v1206_v44  ;;  %v1208_v53 = vmul.f32 1.442695, %v1188_v46  ;;  %v3051_v16 = vadd.f32 %v2158_v48, %v2946_v19  ;;  %v2159_v55 = vpop.f32.mrb[14].mxu0  ;;  %v1480_v57 = vmax.f32 %v1464_v50, 0.0  ;;  %v3088_v50 = vld [vmem:[%s3575_s5] ss:$0 sm:$0xff] }
 0x18b   : > { %v1233_v56 = vadd.f32 1.0, %v2476_v52  ;;  %v1173_v58 = vand.u32 2147483647, %v3046_v51  ;;  %v2160_v60 = vpop.f32.mrb[15].mxu0  ;;  %v1442_v61 = vmul.f32 %v2974_v34, %v3046_v51 }
 0x18c   : > { %2483 = vpow2.f32 %v1208_v53  ;;  %v3058_v62 = vadd.f32 %v2967_v31, %v3051_v16  ;;  %v2161_v63 = vadd.f32 %v2160_v60, %v2159_v55  ;;  %1496 = vst.msk [vmem:[%s2999_s13 + $0x20] sm:$0xff] %vm790_vm0, %v1480_v57 }
 0x18d   : > { %2485 = vlog2.f32 %v1233_v56  ;;  %v1189_v19 = vsub.f32 0.0, %v1173_v58  ;;  %v1465_v0 = vadd.f32 %v2983_v38, %v1442_v61 }
 0x18e   : > { %v1174_v1 = vand.u32 2147483647, %v3058_v62  ;;  %v1443_v2 = vmul.f32 %v2974_v34, %v3058_v62  ;;  %v2162_v4 = vpop.f32.mrb[16].mxu0  ;;  %v3067_v9 = vadd.f32 %v2944_v18, %v2161_v63 }
 0x18f   : > { %v2478_v5 = vpop.eup %2477  ;;  %v1210_v6 = vmul.f32 1.442695, %v1189_v19  ;;  %v2163_v10 = vpop.f32.mrb[17].mxu0  ;;  %v1481_v12 = vmax.f32 %v1465_v0, 0.0 }
 0x190   : > { %v1234_v11 = vadd.f32 1.0, %v2478_v5  ;;  %v1190_v13 = vsub.f32 0.0, %v1174_v1  ;;  %v1466_v14 = vadd.f32 %v2983_v38, %v1443_v2  ;;  %v3072_v28 = vadd.f32 %v2967_v31, %v3067_v9 }
 0x191   : > { %2487 = vpow2.f32 %v1210_v6  ;;  %v2164_v29 = vadd.f32 %v2163_v10, %v2162_v4  ;;  %1497 = vst.msk [vmem:[%s2999_s13 + $0x28] sm:$0xff] %vm790_vm0, %v1481_v12  ;;  %v1153_v2 = vmin.f32 %v2993_v47, 0.0 }
 0x192   : > { %2489 = vlog2.f32 %v1234_v11  ;;  %v1212_v17 = vmul.f32 1.442695, %v1190_v13  ;;  %v1482_v30 = vmax.f32 %v1466_v14, 0.0  ;;  %v2165_v18 = vpop.f32.mrb[18].mxu0  ;;  %v1175_v35 = vand.u32 2147483647, %v3072_v28 }
 0x193   : > { %v2480_v33 = vpop.eup %2479  ;;  %v1444_v37 = vmul.f32 %v2974_v34, %v3072_v28  ;;  %v3080_v39 = vadd.f32 %v2164_v29, %v2950_v21  ;;  %v2166_v43 = vpop.f32.mrb[19].mxu0  ;;  %v1154_v29 = vmin.f32 %v3011_v59, 0.0 }
 0x194   : > { %v2482_v44 = vpop.eup %2481  ;;  %v1249_v46 = vmul.f32 0.6931472, %v2480_v33  ;;  %2491 = vpow2.f32 %v1212_v17  ;;  %1498 = vst.msk [vmem:[%s2999_s13 + $0x30] sm:$0xff] %vm790_vm0, %v1482_v30  ;;  %v2167_v48 = vadd.f32 %v2166_v43, %v2165_v18  ;;  %v1191_v53 = vsub.f32 0.0, %v1175_v35 }
 0x195   : > { %v1235_v52 = vadd.f32 1.0, %v2482_v44  ;;  %v1467_v55 = vadd.f32 %v2983_v38, %v1444_v37  ;;  %v3093_v21 = vadd.f32 %v2967_v31, %v3080_v39 }
 0x196   : > { %v2484_v36 = vpop.eup %2483  ;;  %v1280_v56 = vsub.f32 %v1152_v45, %v1249_v46  ;;  %v3096_v57 = vadd.f32 %v2948_v20, %v2167_v48  ;;  %v2168_v58 = vpop.f32.mrb[20].mxu0  ;;  %v1214_v63 = vmul.f32 1.442695, %v1191_v53 }
 0x197   : > { %v2486_v60 = vpop.eup %2485  ;;  %2493 = vlog2.f32 %v1235_v52  ;;  %v1236_v61 = vadd.f32 1.0, %v2484_v36  ;;  %v1483_v19 = vmax.f32 %v1467_v55, 0.0  ;;  %v2169_v0 = vpop.f32.mrb[21].mxu0  ;;  %v1176_v5 = vand.u32 2147483647, %v3093_v21 }
 0x198   : > { %v1302_v1 = vmul.f32 %v3088_v50, %v1280_v56  ;;  %v1251_v4 = vmul.f32 0.6931472, %v2486_v60  ;;  %v1445_v20 = vmul.f32 %v2974_v34, %v3093_v21  ;;  %v3107_v6 = vadd.f32 %v2967_v31, %v3096_v57 }
 0x199   : > { %2495 = vlog2.f32 %v1236_v61  ;;  %1499 = vst.msk [vmem:[%s2999_s13 + $0x38] sm:$0xff] %vm790_vm0, %v1483_v19  ;;  %v2170_v10 = vadd.f32 %v2169_v0, %v2168_v58  ;;  %v1192_v13 = vsub.f32 0.0, %v1176_v5 }
 0x19a   : > { %v1318_v11 = vmul.f32 1.442695, %v1302_v1  ;;  %v1281_v12 = vsub.f32 %v1153_v2, %v1251_v4  ;;  %2497 = vpow2.f32 %v1214_v63  ;;  %v2171_v14 = vpop.f32.mrb[22].mxu0  ;;  %v1468_v17 = vadd.f32 %v2983_v38, %v1445_v20 }
 0x19b   : > { %v2488_v47 = vpop.eup %2487  ;;  %v1177_v30 = vand.u32 2147483647, %v3107_v6  ;;  %v1446_v18 = vmul.f32 %v2974_v34, %v3107_v6  ;;  %v2172_v33 = vpop.f32.mrb[23].mxu0  ;;  %v1216_v44 = vmul.f32 1.442695, %v1192_v13  ;;  %v3117_v55 = vadd.f32 %v2170_v10, %v2954_v23 }
 0x19c   : > { %v2490_v35 = vpop.eup %2489  ;;  %2499 = vpow2.f32 %v1318_v11  ;;  %v1303_v37 = vmul.f32 %v3088_v50, %v1281_v12  ;;  %v1237_v43 = vadd.f32 1.0, %v2488_v47  ;;  %v1484_v46 = vmax.f32 %v1468_v17, 0.0 }
 0x19d   : > { %v1253_v45 = vmul.f32 0.6931472, %v2490_v35  ;;  %v1193_v48 = vsub.f32 0.0, %v1177_v30  ;;  %v1469_v59 = vadd.f32 %v2983_v38, %v1446_v18  ;;  %v2173_v36 = vadd.f32 %v2172_v33, %v2171_v14 }
 0x19e   : > { %v2492_v52 = vpop.eup %2491  ;;  %v1320_v53 = vmul.f32 1.442695, %v1303_v37  ;;  %2501 = vlog2.f32 %v1237_v43  ;;  %v2174_v56 = vpop.f32.mrb[24].mxu0  ;;  %1500 = vst.msk [vmem:[%s2999_s13 + $0x40] sm:$0xff] %vm790_vm0, %v1484_v46  ;;  %v3123_v0 = vadd.f32 %v2967_v31, %v3117_v55  ;;  %v1155_v4 = vmin.f32 %v3023_v7, 0.0 }
 0x19f   : > { %v1282_v58 = vsub.f32 %v1154_v29, %v1253_v45  ;;  %v1238_v60 = vadd.f32 1.0, %v2492_v52  ;;  %2503 = vpow2.f32 %v1216_v44  ;;  %v1218_v61 = vmul.f32 1.442695, %v1193_v48  ;;  %v2175_v63 = vpop.f32.mrb[25].mxu0 }
 0x1a0   : > { %2505 = vpow2.f32 %v1320_v53  ;;  %v1485_v19 = vmax.f32 %v1469_v59, 0.0  ;;  %v3126_v1 = vadd.f32 %v2952_v22, %v2173_v36  ;;  %v2176_v5 = vadd.f32 %v2175_v63, %v2174_v56 }
 0x1a1   : > { %v2494_v23 = vpop.eup %2493  ;;  %v1304_v2 = vmul.f32 %v3088_v50, %v1282_v58  ;;  %2507 = vlog2.f32 %v1238_v60  ;;  %v1156_v10 = vmin.f32 %v3032_v15, 0.0  ;;  %v1178_v11 = vand.u32 2147483647, %v3123_v0 }
 0x1a2   : > { %v1255_v20 = vmul.f32 0.6931472, %v2494_v23  ;;  %2509 = vpow2.f32 %v1218_v61  ;;  %1501 = vst.msk [vmem:[%s2999_s13 + $0x48] sm:$0xff] %vm790_vm0, %v1485_v19  ;;  %v2177_v12 = vpop.f32.mrb[26].mxu0  ;;  %v1447_v22 = vmul.f32 %v2974_v34, %v3123_v0  ;;  %v3138_v47 = vadd.f32 %v2967_v31, %v3126_v1 }
 0x1a3   : > { %v2496_v13 = vpop.eup %2495  ;;  %v1322_v14 = vmul.f32 1.442695, %v1304_v2  ;;  %v3141_v7 = vadd.f32 %v2176_v5, %v2958_v25  ;;  %v2178_v29 = vpop.f32.mrb[27].mxu0  ;;  %v1194_v18 = vsub.f32 0.0, %v1178_v11  ;;  %v1157_v35 = vmin.f32 %v3046_v51, 0.0 }
 0x1a4   : > { %v2498_v15 = vpop.eup %2497  ;;  %v1283_v17 = vsub.f32 %v1155_v4, %v1255_v20  ;;  %v1257_v30 = vmul.f32 0.6931472, %v2496_v13  ;;  %v2179_v33 = vadd.f32 %v2178_v29, %v2177_v12  ;;  %v1470_v43 = vadd.f32 %v2983_v38, %v1447_v22 }
 0x1a5   : > { %2511 = vpow2.f32 %v1322_v14  ;;  %v1239_v37 = vadd.f32 1.0, %v2498_v15  ;;  %v1220_v48 = vmul.f32 1.442695, %v1194_v18  ;;  %v1179_v25 = vand.u32 2147483647, %v3138_v47 }
 0x1a6   : > { %v2500_v44 = vpop.eup %2499  ;;  %v1305_v45 = vmul.f32 %v3088_v50, %v1283_v17  ;;  %v1284_v46 = vsub.f32 %v1156_v10, %v1257_v30  ;;  %v2180_v59 = vpop.f32.mrb[28].mxu0  ;;  %v1486_v52 = vmax.f32 %v1470_v43, 0.0  ;;  %v1448_v53 = vmul.f32 %v2974_v34, %v3138_v47 }
 0x1a7   : > { %2513 = vlog2.f32 %v1239_v37  ;;  %v3151_v51 = vadd.f32 %v2967_v31, %v3141_v7  ;;  %1366 = vrot.lane.b32.xlu1 %v2500_v44, %s2596_s27  ;;  %v2181_v36 = vpop.f32.mrb[29].mxu0  ;;  %v1195_v61 = vsub.f32 0.0, %v1179_v25  ;;  %v1158_v23 = vmin.f32 %v3058_v62, 0.0 }
 0x1a8   : > { %v2502_v56 = vpop.eup %2501  ;;  %v1324_v58 = vmul.f32 1.442695, %v1305_v45  ;;  %v1306_v60 = vmul.f32 %v3088_v50, %v1284_v46  ;;  %2515 = vpow2.f32 %v1220_v48  ;;  %1502 = vst.msk [vmem:[%s2999_s13 + $0x50] sm:$0xff] %vm790_vm0, %v1486_v52  ;;  %v1471_v2 = vadd.f32 %v2983_v38, %v1448_v53 }
 0x1a9   : > { %v2504_v63 = vpop.eup %2503  ;;  %v1259_v19 = vmul.f32 0.6931472, %v2502_v56  ;;  %v1180_v4 = vand.u32 2147483647, %v3151_v51  ;;  %v1222_v11 = vmul.f32 1.442695, %v1195_v61  ;;  %v1449_v62 = vmul.f32 %v2974_v34, %v3151_v51 }
 0x1aa   : > { %v2506_v5 = vpop.eup %2505  ;;  %2517 = vpow2.f32 %v1324_v58  ;;  %v1326_v20 = vmul.f32 1.442695, %v1306_v60  ;;  %v1240_v10 = vadd.f32 1.0, %v2504_v63  ;;  %v2183_v12 = vpop.f32.mrb[30].mxu0  ;;  %v1487_v22 = vmax.f32 %v1471_v2, 0.0 }
 0x1ab   : > { %v2508_v13 = vpop.eup %2507  ;;  %v1285_v14 = vsub.f32 %v1157_v35, %v1259_v19  ;;  %v1196_v29 = vsub.f32 0.0, %v1180_v4  ;;  %1368 = vrot.lane.b32.xlu0 %v2506_v5, %s2596_s27  ;;  %v2184_v15 = vpop.f32.mrb[31].mxu0  ;;  %v3164_v18 = vadd.f32 %v2956_v24, %v2179_v33  ;;  %v2182_v37 = vadd.f32 %v2181_v36, %v2180_v59 }
 0x1ac   : > { %v2510_v17 = vpop.eup %2509  ;;  %2519 = vpow2.f32 %v1326_v20  ;;  %v1261_v30 = vmul.f32 0.6931472, %v2508_v13  ;;  %1503 = vst.msk [vmem:[%s2999_s13 + $0x58] sm:$0xff] %vm790_vm0, %v1487_v22  ;;  %v1472_v46 = vadd.f32 %v2983_v38, %v1449_v62  ;;  %v2185_v33 = vadd.f32 %v2184_v15, %v2183_v12 }
 0x1ad   : > { %v1307_v43 = vmul.f32 %v3088_v50, %v1285_v14  ;;  %2521 = vlog2.f32 %v1240_v10  ;;  %v1241_v44 = vadd.f32 1.0, %v2510_v17  ;;  %v1224_v35 = vmul.f32 1.442695, %v1196_v29 }
 0x1ae   : > { %v1286_v45 = vsub.f32 %v1158_v23, %v1261_v30  ;;  %2523 = vpow2.f32 %v1222_v11  ;;  %v3172_v48 = vadd.f32 %v2967_v31, %v3164_v18  ;;  %v3175_v24 = vadd.f32 %v2182_v37, %v2962_v27 }
 0x1af   : > { %v2512_v25 = vpop.eup %2511  ;;  %v1328_v52 = vmul.f32 1.442695, %v1307_v43  ;;  %2525 = vlog2.f32 %v1241_v44  ;;  %v1488_v53 = vmax.f32 %v1472_v46, 0.0  ;;  %v1159_v63 = vmin.f32 %v3072_v28, 0.0 }
 0x1b0   : > { %v1308_v59 = vmul.f32 %v3088_v50, %v1286_v45  ;;  %2527 = vpow2.f32 %v1224_v35  ;;  %1370 = vrot.lane.b32.xlu1 %v2512_v25, %s2596_s27  ;;  %v1181_v56 = vand.u32 2147483647, %v3172_v48  ;;  %v1450_v58 = vmul.f32 %v2974_v34, %v3172_v48 }
 0x1b1   : > { %v2514_v36 = vpop.eup %2513  ;;  %2529 = vpow2.f32 %v1328_v52  ;;  %v3184_v60 = vadd.f32 %v2967_v31, %v3175_v24  ;;  %1504 = vst.msk [vmem:[%s2999_s13 + $0x60] sm:$0xff] %vm790_vm0, %v1488_v53  ;;  %v3190_v23 = vadd.f32 %v2960_v26, %v2185_v33  ;;  %v1160_v17 = vmin.f32 %v3093_v21, 0.0 }
 0x1b2   : > { %v2516_v27 = vpop.eup %2515  ;;  %v1330_v61 = vmul.f32 1.442695, %v1308_v59  ;;  %v1263_v19 = vmul.f32 0.6931472, %v2514_v36  ;;  %v1197_v4 = vsub.f32 0.0, %v1181_v56  ;;  %v1473_v5 = vadd.f32 %v2983_v38, %v1450_v58 }
 0x1b3   : > { %v1242_v2 = vadd.f32 1.0, %v2516_v27  ;;  %v1182_v11 = vand.u32 2147483647, %v3184_v60  ;;  %v1451_v12 = vmul.f32 %v2974_v34, %v3184_v60  ;;  %v3198_v26 = vadd.f32 %v2967_v31, %v3190_v23 }
 0x1b4   : > { %v2518_v20 = vpop.eup %2517  ;;  %2531 = vpow2.f32 %v1330_v61  ;;  %v1287_v10 = vsub.f32 %v1159_v63, %v1263_v19  ;;  %v1226_v28 = vmul.f32 1.442695, %v1197_v4  ;;  %v1489_v13 = vmax.f32 %v1473_v5, 0.0 }
 0x1b5   : > { %2533 = vlog2.f32 %v1242_v2  ;;  %1372 = vrot.lane.b32.xlu0 %v2518_v20, %s2596_s27  ;;  %v1198_v29 = vsub.f32 0.0, %v1182_v11  ;;  %v1474_v62 = vadd.f32 %v2983_v38, %v1451_v12  ;;  %v1183_v30 = vand.u32 2147483647, %v3198_v26 }
 0x1b6   : > { %v2520_v14 = vpop.eup %2519  ;;  %v1309_v22 = vmul.f32 %v3088_v50, %v1287_v10  ;;  %2535 = vpow2.f32 %v1226_v28  ;;  %1505 = vst.msk [vmem:[%s2999_s13 + $0x68] sm:$0xff] %vm790_vm0, %v1489_v13  ;;  %v1452_v31 = vmul.f32 %v2974_v34, %v3198_v26  ;;  %v1161_v53 = vmin.f32 %v3107_v6, 0.0 }
 0x1b7   : > { %v2522_v15 = vpop.eup %2521  ;;  %1374 = vrot.lane.b32.xlu1 %v2520_v14, %s2596_s27  ;;  %v1228_v35 = vmul.f32 1.442695, %v1198_v29  ;;  %v1490_v25 = vmax.f32 %v1474_v62, 0.0  ;;  %v1199_v52 = vsub.f32 0.0, %v1183_v30  ;;  %v1162_v5 = vmin.f32 %v3123_v0, 0.0 }
 0x1b8   : > { %v2524_v37 = vpop.eup %2523  ;;  %v1332_v43 = vmul.f32 1.442695, %v1309_v22  ;;  %v1265_v44 = vmul.f32 0.6931472, %v2522_v15  ;;  %v1475_v21 = vadd.f32 %v2983_v38, %v1452_v31  ;;  %v1163_v62 = vmin.f32 %v3138_v47, 0.0 }
 0x1b9   : > { %v2526_v45 = vpop.eup %2525  ;;  %v1243_v46 = vadd.f32 1.0, %v2524_v37  ;;  %1506 = vst.msk [vmem:[%s2999_s13 + $0x70] sm:$0xff] %vm790_vm0, %v1490_v25  ;;  %v1230_v58 = vmul.f32 1.442695, %v1199_v52  ;;  %v1164_v37 = vmin.f32 %v3151_v51, 0.0  ;;  %v1165_v51 = vmin.f32 %v3172_v48, 0.0 }
 0x1ba   : > { %v2528_v33 = vpop.eup %2527  ;;  %2537 = vpow2.f32 %v1332_v43  ;;  %v1288_v59 = vsub.f32 %v1160_v17, %v1265_v44  ;;  %v1267_v34 = vmul.f32 0.6931472, %v2526_v45  ;;  %v1491_v27 = vmax.f32 %v1475_v21, 0.0 }
 0x1bb   : > { %v2530_v36 = vpop.eup %2529  ;;  %2539 = vlog2.f32 %v1243_v46  ;;  %v1244_v56 = vadd.f32 1.0, %v2528_v33 }
 0x1bc   : > { %v1310_v61 = vmul.f32 %v3088_v50, %v1288_v59  ;;  %v1289_v63 = vsub.f32 %v1161_v53, %v1267_v34  ;;  %2541 = vpow2.f32 %v1228_v35  ;;  %1376 = vrot.lane.b32.xlu0 %v2530_v36, %s2596_s27  ;;  %1507 = vst.msk [vmem:[%s2999_s13 + $0x78] sm:$0xff] %vm790_vm0, %v1491_v27 }
 0x1bd   : > { %2543 = vlog2.f32 %v1244_v56 }
 0x1be   : > { %v2532_v38 = vpop.eup %2531  ;;  %v1334_v19 = vmul.f32 1.442695, %v1310_v61  ;;  %v1311_v6 = vmul.f32 %v3088_v50, %v1289_v63  ;;  %2545 = vpow2.f32 %v1230_v58  ;;  %v1166_v58 = vmin.f32 %v3184_v60, 0.0 }
 0x1bf   : > { %v2534_v2 = vpop.eup %2533  ;;  %1378 = vrot.lane.b32.xlu1 %v2532_v38, %s2596_s27 }
 0x1c0   : > { %2547 = vpow2.f32 %v1334_v19  ;;  %v1336_v4 = vmul.f32 1.442695, %v1311_v6  ;;  %v1269_v20 = vmul.f32 0.6931472, %v2534_v2  ;;  %v2536_v10 = vpop.eup %2535  ;;  %v1167_v19 = vmin.f32 %v3198_v26, 0.0 }
 0x1c1   : > { %v1245_v12 = vadd.f32 1.0, %v2536_v10 }
 0x1c2   : > { %2549 = vpow2.f32 %v1336_v4  ;;  %v1290_v11 = vsub.f32 %v1162_v5, %v1269_v20 }
 0x1c3   : > { %2551 = vlog2.f32 %v1245_v12 }
 0x1c4   : > { %v2538_v28 = vpop.eup %2537  ;;  %v1312_v13 = vmul.f32 %v3088_v50, %v1290_v11 }
 0x1c5   : > { %v2540_v14 = vpop.eup %2539  ;;  %1380 = vrot.lane.b32.xlu0 %v2538_v28, %s2596_s27 }
 0x1c6   : > { %v2542_v22 = vpop.eup %2541  ;;  %v1338_v29 = vmul.f32 1.442695, %v1312_v13  ;;  %v1271_v15 = vmul.f32 0.6931472, %v2540_v14 }
 0x1c7   : > { %v2544_v17 = vpop.eup %2543  ;;  %v1246_v30 = vadd.f32 1.0, %v2542_v22 }
 0x1c8   : > { %v2546_v0 = vpop.eup %2545  ;;  %2553 = vpow2.f32 %v1338_v29  ;;  %v1291_v31 = vsub.f32 %v1163_v62, %v1271_v15  ;;  %v1273_v43 = vmul.f32 0.6931472, %v2544_v17 }
 0x1c9   : > { %2555 = vlog2.f32 %v1246_v30  ;;  %v1247_v44 = vadd.f32 1.0, %v2546_v0 }
 0x1ca   : > { %v2548_v35 = vpop.eup %2547  ;;  %v1313_v45 = vmul.f32 %v3088_v50, %v1291_v31  ;;  %v1292_v46 = vsub.f32 %v1164_v37, %v1273_v43 }
 0x1cb   : > { %2557 = vlog2.f32 %v1247_v44  ;;  %1382 = vrot.lane.b32.xlu1 %v2548_v35, %s2596_s27 }
 0x1cc   : > { %v2550_v25 = vpop.eup %2549  ;;  %v1340_v47 = vmul.f32 1.442695, %v1313_v45  ;;  %v1314_v52 = vmul.f32 %v3088_v50, %v1292_v46 }
 0x1cd   : > { %1384 = vrot.lane.b32.xlu0 %v2550_v25, %s2596_s27  ;;  %v2552_v21 = vpop.eup %2551 }
 0x1ce   : > { %2559 = vpow2.f32 %v1340_v47  ;;  %v1342_v33 = vmul.f32 1.442695, %v1314_v52  ;;  %v1275_v59 = vmul.f32 0.6931472, %v2552_v21 }
 0x1d0   : > { %2561 = vpow2.f32 %v1342_v33  ;;  %v1293_v53 = vsub.f32 %v1165_v51, %v1275_v59 }
 0x1d2   : > { %v2554_v34 = vpop.eup %2553  ;;  %v1315_v56 = vmul.f32 %v3088_v50, %v1293_v53 }
 0x1d3   : > { %v2556_v36 = vpop.eup %2555  ;;  %1386 = vrot.lane.b32.xlu1 %v2554_v34, %s2596_s27  ;;  %v3314_v34 = vld [vmem:[%s400_s15] ss:$0 sm:$0xff] }
 0x1d4   : > { %v1277_v27 = vmul.f32 0.6931472, %v2556_v36  ;;  %v1344_v63 = vmul.f32 1.442695, %v1315_v56 }
 0x1d5   : > { %v2558_v61 = vpop.eup %2557 }
 0x1d6   : > { %v1294_v38 = vsub.f32 %v1166_v58, %v1277_v27  ;;  %v1279_v6 = vmul.f32 0.6931472, %v2558_v61  ;;  %2563 = vpow2.f32 %v1344_v63 }
 0x1d8   : > { %v2560_v48 = vpop.eup %2559  ;;  %v1316_v2 = vmul.f32 %v3088_v50, %v1294_v38  ;;  %v1295_v4 = vsub.f32 %v1167_v19, %v1279_v6 }
 0x1d9   : > { %1388 = vrot.lane.b32.xlu0 %v2560_v48, %s2596_s27 }
 0x1da   : > { %v2562_v5 = vpop.eup %2561  ;;  %v1346_v20 = vmul.f32 1.442695, %v1316_v2  ;;  %v1317_v10 = vmul.f32 %v3088_v50, %v1295_v4 }
 0x1db   : > { %1390 = vrot.lane.b32.xlu1 %v2562_v5, %s2596_s27 }
 0x1dc   : > { %2565 = vpow2.f32 %v1346_v20  ;;  %v1348_v60 = vmul.f32 1.442695, %v1317_v10  ;;  %v2598_v20 = vmov 0.0  }
 0x1dd   : > { %430 = vst.msk [vmem:[%s3383_s25 + $0x8] sm:$0xff] %vm428_vm4, %v2598_v20  ;;  %429 = vst.msk [vmem:[%s3383_s25] sm:$0xff] %vm428_vm4, %v2598_v20 }
 0x1de   : > { %2567 = vpow2.f32 %v1348_v60  ;;  %431 = vst.msk [vmem:[%s3383_s25 + $0x10] sm:$0xff] %vm428_vm4, %v2598_v20  ;;  %432 = vst.msk [vmem:[%s3383_s25 + $0x18] sm:$0xff] %vm428_vm4, %v2598_v20 }
 0x1df   : > { %433 = vst.msk [vmem:[%s3383_s25 + $0x20] sm:$0xff] %vm428_vm4, %v2598_v20  ;;  %434 = vst.msk [vmem:[%s3383_s25 + $0x28] sm:$0xff] %vm428_vm4, %v2598_v20 }
 0x1e0   : > { %v2564_v11 = vpop.eup %2563  ;;  %435 = vst.msk [vmem:[%s3383_s25 + $0x30] sm:$0xff] %vm428_vm4, %v2598_v20  ;;  %436 = vst.msk [vmem:[%s3383_s25 + $0x38] sm:$0xff] %vm428_vm4, %v2598_v20 }
 0x1e1   : > { %1392 = vrot.lane.b32.xlu0 %v2564_v11, %s2596_s27  ;;  %437 = vst.msk [vmem:[%s3383_s25 + $0x40] sm:$0xff] %vm428_vm4, %v2598_v20  ;;  %438 = vst.msk [vmem:[%s3383_s25 + $0x48] sm:$0xff] %vm428_vm4, %v2598_v20 }
 0x1e2   : > { %439 = vst.msk [vmem:[%s3383_s25 + $0x50] sm:$0xff] %vm428_vm4, %v2598_v20  ;;  %440 = vst.msk [vmem:[%s3383_s25 + $0x58] sm:$0xff] %vm428_vm4, %v2598_v20 }
 0x1e3   : > { %441 = vst.msk [vmem:[%s3383_s25 + $0x60] sm:$0xff] %vm428_vm4, %v2598_v20  ;;  %442 = vst.msk [vmem:[%s3383_s25 + $0x68] sm:$0xff] %vm428_vm4, %v2598_v20 }
 0x1e4   : > { %443 = vst.msk [vmem:[%s3383_s25 + $0x70] sm:$0xff] %vm428_vm4, %v2598_v20  ;;  %444 = vst.msk [vmem:[%s3383_s25 + $0x78] sm:$0xff] %vm428_vm4, %v2598_v20 }
 0x1e6   : > { %v2566_v26 = vpop.eup %2565 }
 0x1e7   : > { %1394 = vrot.lane.b32.xlu1 %v2566_v26, %s2596_s27 }
 0x1e8   : > { %v2568_v12 = vpop.eup %2567 }
 0x1e9   : > { %1396 = vrot.lane.b32.xlu0 %v2568_v12, %s2596_s27 }
 0x219   : > { %v3241_v28 = vpop.permute.xlu1 %1366 }
 0x21a   : > { %v1414_v50 = vmul.f32 %v3241_v28, %v2969_v32 }
 0x21d   : > { %v3243_v13 = vpop.permute.xlu0 %1368 }
 0x21e   : > { %v1415_v14 = vmul.f32 %v3243_v13, %v2988_v42 }
 0x220   : > { %v2433_v22 = vpack.i.bf16 %v1415_v14, %v1414_v50 }
 0x222   : > { %2434 = vrot.lane.b32.xlu1 %v2433_v22, %s2597_s28  ;;  %v3250_v29 = vpop.permute.xlu1 %1370 }
 0x223   : > { %v1416_v15 = vmul.f32 %v3250_v29, %v3004_v54 }
 0x227   : > { %v3252_v62 = vpop.permute.xlu0 %1372 }
 0x228   : > { %v1417_v17 = vmul.f32 %v3252_v62, %v3016_v3 }
 0x229   : > { %v3258_v0 = vpop.permute.xlu1 %1374 }
 0x22a   : > { %v2438_v30 = vpack.i.bf16 %v1417_v17, %v1416_v15  ;;  %v1418_v42 = vmul.f32 %v3258_v0, %v3025_v8 }
 0x22c   : > { %2439 = vrot.lane.b32.xlu0 %v2438_v30, %s2597_s28 }
 0x22e   : > { %v3261_v32 = vpop.permute.xlu0 %1376 }
 0x22f   : > { %v1419_v31 = vmul.f32 %v3261_v32, %v3041_v41 }
 0x231   : > { %v2443_v37 = vpack.i.bf16 %v1419_v31, %v1418_v42  ;;  %v3268_v54 = vpop.permute.xlu1 %1378 }
 0x232   : > { %v1420_v3 = vmul.f32 %v3268_v54, %v3051_v16 }
 0x233   : > { %2444 = vrot.lane.b32.xlu1 %v2443_v37, %s2597_s28 }
 0x237   : > { %v3270_v43 = vpop.permute.xlu0 %1380 }
 0x238   : > { %v1421_v44 = vmul.f32 %v3270_v43, %v3067_v9 }
 0x23a   : > { %v2448_v35 = vpack.i.bf16 %v1421_v44, %v1420_v3 }
 0x23c   : > { %2449 = vrot.lane.b32.xlu0 %v2448_v35, %s2597_s28 }
 0x23d   : > { %v3277_v8 = vpop.permute.xlu1 %1382 }
 0x23e   : > { %v1422_v45 = vmul.f32 %v3277_v8, %v3080_v39 }
 0x23f   : > { %v3279_v41 = vpop.permute.xlu0 %1384 }
 0x240   : > { %v1423_v46 = vmul.f32 %v3279_v41, %v3096_v57 }
 0x242   : > { %v2453_v25 = vpack.i.bf16 %v1423_v46, %v1422_v45 }
 0x244   : > { %2454 = vrot.lane.b32.xlu1 %v2453_v25, %s2597_s28 }
 0x245   : > { %v3286_v16 = vpop.permute.xlu1 %1386 }
 0x246   : > { %v1424_v47 = vmul.f32 %v3286_v16, %v3117_v55 }
 0x24b   : > { %v3288_v9 = vpop.permute.xlu0 %1388 }
 0x24c   : > { %v1425_v52 = vmul.f32 %v3288_v9, %v3126_v1  ;;  %v1509_v1 = vshrl.u32 %v463_v40, 7 }
 0x24d   : > { %v3295_v39 = vpop.permute.xlu1 %1390 }
 0x24e   : > { %v2458_v21 = vpack.i.bf16 %v1425_v52, %v1424_v47  ;;  %v1426_v57 = vmul.f32 %v3295_v39, %v3141_v7  ;;  %v3316_v7 = vadd.s32 8, %v1509_v1  ;;  %vm1529_vm7 = vcmp.eq.s32.totalorder %v1509_v1, %v3314_v34 }
 0x24f   : > { %v3323_v56 = vadd.s32 16, %v1509_v1  ;;  %2302 = vmatprep.mubr.msk.f32.mxu1 %vm1529_vm7, %v2595_v49  ;;  %v3328_v40 = vadd.s32 24, %v1509_v1  ;;  %v3343_v27 = vadd.s32 48, %v1509_v1  ;;  %v3345_v61 = vadd.s32 56, %v1509_v1 }
 0x250   : > { %2459 = vrot.lane.b32.xlu0 %v2458_v21, %s2597_s28  ;;  %vm1530_vm8 = vcmp.eq.s32.totalorder %v3316_v7, %v3314_v34  ;;  %v3351_v63 = vadd.s32 64, %v1509_v1  ;;  %v3353_v38 = vadd.s32 72, %v1509_v1  ;;  %v3359_v19 = vadd.s32 80, %v1509_v1 }
 0x251   : > { %vm1531_vm9 = vcmp.eq.s32.totalorder %v3323_v56, %v3314_v34  ;;  %vm1532_vm10 = vcmp.eq.s32.totalorder %v3328_v40, %v3314_v34  ;;  %vm1535_vm13 = vcmp.eq.s32.totalorder %v3343_v27, %v3314_v34  ;;  %vm1536_vm14 = vcmp.eq.s32.totalorder %v3345_v61, %v3314_v34  ;;  %v1660_v40 = vld [vmem:[%s3383_s25 + $0x18] sm:$0xff]  ;;  %v1662_v61 = vld [vmem:[%s3383_s25 + $0x28] sm:$0xff] }
 0x252   : > { %vm1537_vm15 = vcmp.eq.s32.totalorder %v3351_v63, %v3314_v34  ;;  %vm1538_vm1 = vcmp.eq.s32.totalorder %v3353_v38, %v3314_v34  ;;  %v3361_v6 = vadd.s32 88, %v1509_v1  ;;  %vm1539_vm2 = vcmp.eq.s32.totalorder %v3359_v19, %v3314_v34  ;;  %v1661_v63 = vld [vmem:[%s3383_s25 + $0x20] sm:$0xff] }
 0x253   : > { %v3297_v33 = vpop.permute.xlu0 %1392  ;;  %v3367_v48 = vadd.s32 96, %v1509_v1  ;;  %v3369_v2 = vadd.s32 104, %v1509_v1  ;;  %v3375_v4 = vadd.s32 112, %v1509_v1  ;;  %v3377_v5 = vadd.s32 120, %v1509_v1 }
 0x254   : > { %v1427_v51 = vmul.f32 %v3297_v33, %v3164_v18  ;;  %vm1540_vm3 = vcmp.eq.s32.totalorder %v3361_v6, %v3314_v34 }
 0x255   : > { %vm1541_vm6 = vcmp.eq.s32.totalorder %v3367_v48, %v3314_v34  ;;  %vm1543_vm5 = vcmp.eq.s32.totalorder %v3375_v4, %v3314_v34  ;;  %vm1544_vm7 = vcmp.eq.s32.totalorder %v3377_v5, %v3314_v34  ;;  %v1663_v4 = vld [vmem:[%s3383_s25 + $0x30] sm:$0xff] }
 0x256   : > { %v2463_v59 = vpack.i.bf16 %v1427_v51, %v1426_v57 }
 0x258   : > { %2464 = vrot.lane.b32.xlu1 %v2463_v59, %s2597_s28 }
 0x259   : > { %v3305_v55 = vpop.permute.xlu1 %1394 }
 0x25a   : > { %v1428_v18 = vmul.f32 %v3305_v55, %v3175_v24  ;;  %v3335_v24 = vadd.s32 32, %v1509_v1 }
 0x25b   : > { %v3312_v53 = vpop.permute.xlu0 %1396 }
 0x25c   : > { %v1429_v36 = vmul.f32 %v3312_v53, %v3190_v23  ;;  %v3337_v23 = vadd.s32 40, %v1509_v1  ;;  %vm1533_vm11 = vcmp.eq.s32.totalorder %v3335_v24, %v3314_v34  ;;  %v1659_v24 = vld [vmem:[%s3383_s25 + $0x10] sm:$0xff] }
 0x25e   : > { %v2468_v58 = vpack.i.bf16 %v1429_v36, %v1428_v18  ;;  %vm1534_vm12 = vcmp.eq.s32.totalorder %v3337_v23, %v3314_v34 }
 0x260   : > { %2469 = vrot.lane.b32.xlu0 %v2468_v58, %s2597_s28 }
 0x294   : > { %v2435_v10 = vpop.permute.xlu1 %2434 }
 0x295   : > { %v2437_v60 = vunpack.i.h.bf16 %v2435_v10  ;;  %v2436_v11 = vunpack.i.l.bf16 %v2435_v10 }
 0x297   : > { %v1641_v26 = vsel %vm790_vm0, %v2436_v11, %v3241_v28  ;;  %v1642_v12 = vsel %vm790_vm0, %v2437_v60, %v3243_v13 }
 0x298   : > { %v2366_v50 = vpack.c.bf16 %v1642_v12, %v1641_v26 }
 0x29a   : > { %2367 = vmatprep.subr.bf16.mxu1 %v2366_v50 }
 0x29b   : > { %2369 = vmatpush3.bf16.msra.mxu1 %v2366_v50 }
 0x29e   : > { %v2440_v14 = vpop.permute.xlu0 %2439 }
 0x29f   : > { %v2442_v22 = vunpack.i.h.bf16 %v2440_v14  ;;  %v2441_v15 = vunpack.i.l.bf16 %v2440_v14 }
 0x2a1   : > { %v1643_v17 = vsel %vm790_vm0, %v2441_v15, %v3250_v29  ;;  %v1644_v30 = vsel %vm790_vm0, %v2442_v22, %v3252_v62  ;;  %v1666_v15 = vld [vmem:[%s3383_s25 + $0x48] sm:$0xff] }
 0x2a2   : > { %v2370_v42 = vpack.c.bf16 %v1644_v30, %v1643_v17  ;;  %v1665_v17 = vld [vmem:[%s3383_s25 + $0x40] sm:$0xff] }
 0x2a4   : > { %2371 = vmatprep.subr.bf16.mxu1 %v2370_v42 }
 0x2a5   : > { %2373 = vmatpush3.bf16.msra.mxu1 %v2370_v42  ;;  %v2445_v31 = vpop.permute.xlu1 %2444 }
 0x2a6   : > { %v2447_v28 = vunpack.i.h.bf16 %v2445_v31  ;;  %v2446_v37 = vunpack.i.l.bf16 %v2445_v31 }
 0x2a8   : > { %v1645_v13 = vsel %vm790_vm0, %v2446_v37, %v3258_v0  ;;  %v1646_v3 = vsel %vm790_vm0, %v2447_v28, %v3261_v32  ;;  %v1668_v37 = vld [vmem:[%s3383_s25 + $0x58] sm:$0xff] }
 0x2a9   : > { %v2374_v44 = vpack.c.bf16 %v1646_v3, %v1645_v13  ;;  %v1667_v13 = vld [vmem:[%s3383_s25 + $0x50] sm:$0xff] }
 0x2ab   : > { %2375 = vmatprep.subr.bf16.mxu1 %v2374_v44 }
 0x2ac   : > { %2377 = vmatpush3.bf16.msra.mxu1 %v2374_v44 }
 0x2ae   : > { %v2450_v35 = vpop.permute.xlu0 %2449 }
 0x2af   : > { %v2452_v29 = vunpack.i.h.bf16 %v2450_v35  ;;  %v2451_v45 = vunpack.i.l.bf16 %v2450_v35 }
 0x2b1   : > { %v1647_v62 = vsel %vm790_vm0, %v2451_v45, %v3268_v54  ;;  %v1648_v46 = vsel %vm790_vm0, %v2452_v29, %v3270_v43  ;;  %v1670_v45 = vld [vmem:[%s3383_s25 + $0x68] sm:$0xff] }
 0x2b2   : > { %v2378_v25 = vpack.c.bf16 %v1648_v46, %v1647_v62  ;;  %v1669_v62 = vld [vmem:[%s3383_s25 + $0x60] sm:$0xff] }
 0x2b4   : > { %2379 = vmatprep.subr.bf16.mxu1 %v2378_v25 }
 0x2b5   : > { %2381 = vmatpush3.bf16.msra.mxu1 %v2378_v25 }
 0x2b6   : > { %v2455_v47 = vpop.permute.xlu1 %2454 }
 0x2b7   : > { %v2457_v0 = vunpack.i.h.bf16 %v2455_v47  ;;  %v2456_v52 = vunpack.i.l.bf16 %v2455_v47 }
 0x2b9   : > { %v1649_v32 = vsel %vm790_vm0, %v2456_v52, %v3277_v8  ;;  %v1650_v21 = vsel %vm790_vm0, %v2457_v0, %v3279_v41  ;;  %v1672_v52 = vld [vmem:[%s3383_s25 + $0x78] sm:$0xff] }
 0x2ba   : > { %v2382_v57 = vpack.c.bf16 %v1650_v21, %v1649_v32  ;;  %v1671_v32 = vld [vmem:[%s3383_s25 + $0x70] sm:$0xff] }
 0x2bc   : > { %2383 = vmatprep.subr.bf16.mxu1 %v2382_v57 }
 0x2bd   : > { %2385 = vmatpush3.bf16.msra.mxu1 %v2382_v57 }
 0x2c2   : > { %v2460_v51 = vpop.permute.xlu0 %2459 }
 0x2c3   : > { %v2462_v54 = vunpack.i.h.bf16 %v2460_v51  ;;  %v2461_v59 = vunpack.i.l.bf16 %v2460_v51 }
 0x2c5   : > { %v1651_v43 = vsel %vm790_vm0, %v2461_v59, %v3286_v16  ;;  %v1652_v1 = vsel %vm790_vm0, %v2462_v54, %v3288_v9 }
 0x2c6   : > { %v2386_v18 = vpack.c.bf16 %v1652_v1, %v1651_v43 }
 0x2c8   : > { %2387 = vmatprep.subr.bf16.mxu1 %v2386_v18 }
 0x2c9   : > { %2389 = vmatpush3.bf16.msra.mxu1 %v2386_v18 }
 0x2ca   : > { %v2465_v36 = vpop.permute.xlu1 %2464 }
 0x2cb   : > { %v2467_v8 = vunpack.i.h.bf16 %v2465_v36  ;;  %v2466_v58 = vunpack.i.l.bf16 %v2465_v36 }
 0x2cd   : > { %v1653_v41 = vsel %vm790_vm0, %v2466_v58, %v3295_v39  ;;  %v1654_v20 = vsel %vm790_vm0, %v2467_v8, %v3297_v33  ;;  %v1658_v39 = vld [vmem:[%s3383_s25 + $0x8] sm:$0xff]  ;;  %v1657_v33 = vld [vmem:[%s3383_s25] sm:$0xff] }
 0x2ce   : > { %v2390_v10 = vpack.c.bf16 %v1654_v20, %v1653_v41 }
 0x2d0   : > { %2391 = vmatprep.subr.bf16.mxu1 %v2390_v10 }
 0x2d1   : > { %2393 = vmatpush3.bf16.msra.mxu1 %v2390_v10 }
 0x2d2   : > { %v2470_v60 = vpop.permute.xlu0 %2469 }
 0x2d3   : > { %v2472_v16 = vunpack.i.h.bf16 %v2470_v60  ;;  %v2471_v11 = vunpack.i.l.bf16 %v2470_v60 }
 0x2d5   : > { %v1655_v9 = vsel %vm790_vm0, %v2471_v11, %v3305_v55  ;;  %v1656_v26 = vsel %vm790_vm0, %v2472_v16, %v3312_v53  ;;  %vm3580_vm0 = vcmp.eq.s32.totalorder %v3369_v2, %v3314_v34  ;;  %v1664_v2 = vld [vmem:[%s3383_s25 + $0x38] sm:$0xff] }
 0x2d6   : > { %v2394_v12 = vpack.c.bf16 %v1656_v26, %v1655_v9 }
 0x2d8   : > { %2395 = vmatprep.subr.bf16.mxu1 %v2394_v12 }
 0x2d9   : > { %2397 = vmatpush3.bf16.msra.mxu1 %v2394_v12 }
 0x2dc   : > { %2303 = vmatmul.mubr.msk.f32.vlgmr.msra.gmra.mrb[16].mxu1 %vm1530_vm8, %v2595_v49 }
 0x2dd   : > { %2305 = vmatprep.mubr.msk.f32.mxu1 %vm1531_vm9, %v2595_v49 }
 0x2e0   : > { %2306 = vmatmul.mubr.msk.f32.gmra.mrb[18].mxu1 %vm1532_vm10, %v2595_v49 }
 0x2e1   : > { %2308 = vmatprep.mubr.msk.f32.mxu1 %vm1533_vm11, %v2595_v49 }
 0x2e4   : > { %2309 = vmatmul.mubr.msk.f32.gmra.mrb[20].mxu1 %vm1534_vm12, %v2595_v49 }
 0x2e5   : > { %2311 = vmatprep.mubr.msk.f32.mxu1 %vm1535_vm13, %v2595_v49 }
 0x2e8   : > { %2312 = vmatmul.mubr.msk.f32.gmra.mrb[22].mxu1 %vm1536_vm14, %v2595_v49 }
 0x2e9   : > { %2314 = vmatprep.mubr.msk.f32.mxu1 %vm1537_vm15, %v2595_v49 }
 0x2ec   : > { %2315 = vmatmul.mubr.msk.f32.gmra.mrb[24].mxu1 %vm1538_vm1, %v2595_v49 }
 0x2ed   : > { %2317 = vmatprep.mubr.msk.f32.mxu1 %vm1539_vm2, %v2595_v49 }
 0x2f0   : > { %2318 = vmatmul.mubr.msk.f32.gmra.mrb[26].mxu1 %vm1540_vm3, %v2595_v49 }
 0x2f1   : > { %2320 = vmatprep.mubr.msk.f32.mxu1 %vm1541_vm6, %v2595_v49 }
 0x2f4   : > { %2321 = vmatmul.mubr.msk.f32.gmra.mrb[28].mxu1 %vm3580_vm0, %v2595_v49 }
 0x2f5   : > { %2323 = vmatprep.mubr.msk.f32.mxu1 %vm1543_vm5, %v2595_v49 }
 0x2f8   : > { %2324 = vmatmul.mubr.msk.f32.gmra.mrb[30].mxu1 %vm1544_vm7, %v2595_v49 }
 0x3af   : > { %v2304_v55 = vpop.f32.mrb[16].mxu1 }
 0x3b0   : > { %v1819_v53 = vadd.f32 %v2304_v55, %v1658_v39  ;;  %v1739_v7 = vpop.f32.mrb[17].mxu1 }
 0x3b1   : > { %v1818_v56 = vadd.f32 %v1739_v7, %v1657_v33 }
 0x3b2   : > { %1836 = vst.msk [vmem:[%s3383_s25 + $0x8] sm:$0xff] %vm428_vm4, %v1819_v53 }
 0x3b3   : > { %1835 = vst.msk [vmem:[%s3383_s25] sm:$0xff] %vm428_vm4, %v1818_v56  ;;  %v2307_v49 = vpop.f32.mrb[18].mxu1 }
 0x3b4   : > { %v1821_v34 = vadd.f32 %v2307_v49, %v1660_v40  ;;  %v1749_v23 = vpop.f32.mrb[19].mxu1 }
 0x3b5   : > { %v1820_v27 = vadd.f32 %v1749_v23, %v1659_v24 }
 0x3b6   : > { %1838 = vst.msk [vmem:[%s3383_s25 + $0x18] sm:$0xff] %vm428_vm4, %v1821_v34 }
 0x3b7   : > { %1837 = vst.msk [vmem:[%s3383_s25 + $0x10] sm:$0xff] %vm428_vm4, %v1820_v27  ;;  %v2310_v38 = vpop.f32.mrb[20].mxu1 }
 0x3b8   : > { %v1823_v19 = vadd.f32 %v2310_v38, %v1662_v61  ;;  %v1759_v6 = vpop.f32.mrb[21].mxu1 }
 0x3b9   : > { %v1822_v48 = vadd.f32 %v1759_v6, %v1661_v63 }
 0x3ba   : > { %1840 = vst.msk [vmem:[%s3383_s25 + $0x28] sm:$0xff] %vm428_vm4, %v1823_v19 }
 0x3bb   : > { %1839 = vst.msk [vmem:[%s3383_s25 + $0x20] sm:$0xff] %vm428_vm4, %v1822_v48  ;;  %v2313_v5 = vpop.f32.mrb[22].mxu1 }
 0x3bc   : > { %v1825_v50 = vadd.f32 %v2313_v5, %v1664_v2  ;;  %v1769_v14 = vpop.f32.mrb[23].mxu1 }
 0x3bd   : > { %v1824_v22 = vadd.f32 %v1769_v14, %v1663_v4 }
 0x3be   : > { %1842 = vst.msk [vmem:[%s3383_s25 + $0x38] sm:$0xff] %vm428_vm4, %v1825_v50 }
 0x3bf   : > { %1841 = vst.msk [vmem:[%s3383_s25 + $0x30] sm:$0xff] %vm428_vm4, %v1824_v22  ;;  %v2316_v30 = vpop.f32.mrb[24].mxu1 }
 0x3c0   : > { %v1827_v42 = vadd.f32 %v2316_v30, %v1666_v15  ;;  %v1779_v31 = vpop.f32.mrb[25].mxu1 }
 0x3c1   : > { %v1826_v28 = vadd.f32 %v1779_v31, %v1665_v17 }
 0x3c2   : > { %1844 = vst.msk [vmem:[%s3383_s25 + $0x48] sm:$0xff] %vm428_vm4, %v1827_v42 }
 0x3c3   : > { %1843 = vst.msk [vmem:[%s3383_s25 + $0x40] sm:$0xff] %vm428_vm4, %v1826_v28  ;;  %v2319_v3 = vpop.f32.mrb[26].mxu1 }
 0x3c4   : > { %v1829_v44 = vadd.f32 %v2319_v3, %v1668_v37  ;;  %v1789_v35 = vpop.f32.mrb[27].mxu1 }
 0x3c5   : > { %v1828_v29 = vadd.f32 %v1789_v35, %v1667_v13 }
 0x3c6   : > { %1846 = vst.msk [vmem:[%s3383_s25 + $0x58] sm:$0xff] %vm428_vm4, %v1829_v44 }
 0x3c7   : > { %1845 = vst.msk [vmem:[%s3383_s25 + $0x50] sm:$0xff] %vm428_vm4, %v1828_v29  ;;  %v2322_v46 = vpop.f32.mrb[28].mxu1 }
 0x3c8   : > { %v1831_v25 = vadd.f32 %v2322_v46, %v1670_v45  ;;  %v1799_v47 = vpop.f32.mrb[29].mxu1 }
 0x3c9   : > { %v1830_v0 = vadd.f32 %v1799_v47, %v1669_v62 }
 0x3ca   : > { %1848 = vst.msk [vmem:[%s3383_s25 + $0x68] sm:$0xff] %vm428_vm4, %v1831_v25 }
 0x3cb   : > { %1847 = vst.msk [vmem:[%s3383_s25 + $0x60] sm:$0xff] %vm428_vm4, %v1830_v0  ;;  %v2325_v21 = vpop.f32.mrb[30].mxu1 }
 0x3cc   : > { %v1833_v57 = vadd.f32 %v2325_v21, %v1672_v52  ;;  %v1809_v51 = vpop.f32.mrb[31].mxu1 }
 0x3cd   : > { %v1832_v54 = vadd.f32 %v1809_v51, %v1671_v32 }
 0x3ce   : > { %1850 = vst.msk [vmem:[%s3383_s25 + $0x78] sm:$0xff] %vm428_vm4, %v1833_v57 }
 0x3cf   : > { %1849 = vst.msk [vmem:[%s3383_s25 + $0x70] sm:$0xff] %vm428_vm4, %v1832_v54 }
 0x3d0 PF: > { %s20_s11 = sadd.s32 1, %s2591_s11   ;;  %s3581_s30 = smov %s2587_s10 }
 0x3d1   : > { %p17_p6 = scmp.ge.s32.totalorder %s20_s11, 4   ;;  %s3582_s10 = smov %s3584_s12 }
 0x3d3   :  { %19 = sbr.rel (!%p17_p6) target bundleno = 2 (0x2), region = 104 }

</bundles_post_ra>
